<compile_context>
chip_gen: v5e
topology: v5e:2x2
jax: 0.10.0
libtpu: 0.0.40
codegen_flags: <defaults>
</compile_context>

<pallas_src>
import jax
import jax.numpy as jnp
from jax.experimental import pallas as pl
from jax.experimental.pallas import tpu as pltpu


def make_cab_forward(batch_size: int, hid_dim: int, n_heads: int, params,
                     block_b=None):
    assert hid_dim % n_heads == 0
    B, H, NH = batch_size, hid_dim, n_heads
    D = H // NH
    inv_scale = 1.0 / (float(D) ** 0.5)

    # Batch tile (lane axis). Full batch when small; otherwise lane-dense
    # multiples of 128 with >=2 grid steps so v7x can use both TensorCores.
    if block_b is not None:
        TB = block_b
    elif B <= 256:
        TB = B
    else:
        TB = 512 if B >= 1024 else 256
    grid = (pl.cdiv(B, TB),)

    # ---- one-time parameter preprocessing (no per-call transposes) ----------
    wq, bq, wk, bk, wv, bv, wfc, bfc = params
    f32, bf16 = jnp.float32, jnp.bfloat16

    # torch Linear y = x @ W.T + b, computed feature-major: y^T = W @ x^T + b.
    # Fuse the three projections into one block-diagonal (3H, 3H) weight so the
    # MXU sees ONE K=3H matmul instead of three tiny K=H ones.  1/sqrt(D) is
    # folded into the Q block (Q only feeds the energy).
    # NOTE: tuned for small hid_dim (this module's regime); for very large H
    # the 2/3-zero weight would waste MXU work and VMEM -> split back.
    wq_s = jnp.asarray(wq, f32) * inv_scale
    wk_s = jnp.asarray(wk, f32)
    wv_s = jnp.asarray(wv, f32)
    w_qkv = jnp.zeros((3 * H, 3 * H), f32)
    w_qkv = w_qkv.at[0 * H:1 * H, 0 * H:1 * H].set(wq_s)
    w_qkv = w_qkv.at[1 * H:2 * H, 1 * H:2 * H].set(wk_s)
    w_qkv = w_qkv.at[2 * H:3 * H, 2 * H:3 * H].set(wv_s)
    w_qkv = w_qkv.astype(bf16)
    b_qkv = jnp.concatenate([jnp.asarray(bq, f32) * inv_scale,
                             jnp.asarray(bk, f32),
                             jnp.asarray(bv, f32)]).reshape(3 * H, 1)

    # Fold permute(0,2,1,3).contiguous().view(B, H) into the FC weight and keep
    # it feature-major:  wfc_feat[o, h*D + i] = wfc[o, i*NH + h]
    wfc_feat = jnp.transpose(jnp.asarray(wfc, f32).reshape(H, D, NH),
                             (0, 2, 1)).reshape(H, H).astype(bf16)
    bfc_c = jnp.asarray(bfc, f32).reshape(H, 1)

    def kernel(x_ref, wqkv_ref, bqkv_ref, wfc_ref, bfc_ref, o_ref):
        tb = x_ref.shape[1]

        # Fused QKV projection, feature-major: (3H,3H) @ (3H,TB) -> (3H,TB).
        qkv = jnp.dot(wqkv_ref[...], x_ref[...],
                      preferred_element_type=jnp.float32) + bqkv_ref[...]

        # (3H, TB) -> three (NH, D, TB): batch stays on the lane axis, head_dim
        # on sublanes (whole-vreg static slices, no data movement).
        Q3 = qkv[0 * H:1 * H].reshape(NH, D, tb)      # 1/sqrt(D) already in Q
        K3 = qkv[1 * H:2 * H].reshape(NH, D, tb)
        V3 = qkv[2 * H:3 * H].reshape(NH, D, tb)

        # Exact row max of the rank-1 energy without materializing it:
        #   max_j q_i*k_j = q_i * (kmax if q_i >= 0 else kmin)
        kmax = jnp.max(K3, axis=1, keepdims=True)      # (NH, 1, TB)
        kmin = jnp.min(K3, axis=1, keepdims=True)
        rowmax = jnp.where(Q3 >= 0.0, Q3 * kmax, Q3 * kmin)   # (NH, D, TB)

        # Streaming softmax over j: live set stays (NH, D, TB)-sized, never the
        # full (NH, D, D, TB) energy/p tensors -> no vreg spills.
        denom = jnp.zeros_like(Q3)
        numer = jnp.zeros_like(Q3)
        for j in range(D):                  # D is small & static (trace-time unroll)
            kj = K3[:, j:j + 1, :]          # (NH, 1, TB)
            vj = V3[:, j:j + 1, :]
            p = jnp.exp(Q3 * kj - rowmax)   # (NH, D, TB), p <= 1
            denom = denom + p
            numer = numer + p * vj
        out3 = numer * pl.reciprocal(denom, approx=True)   # softmax @ V

        # Head-interleaved flatten of the reference is folded into wfc_ref.
        # Stay feature-major so the output store is lane-dense (last dim = TB).
        out_flat = out3.reshape(NH * D, tb).astype(jnp.bfloat16)    # (H, TB)
        o_ref[...] = jnp.dot(wfc_ref[...], out_flat,
                             preferred_element_type=jnp.float32) + bfc_ref[...]

    act_spec = pl.BlockSpec((3 * H, TB), lambda i: (0, i))
    out_spec = pl.BlockSpec((H, TB), lambda i: (0, i))

    def build_call(buffered_weights: bool):
        def w_spec(shape):
            if buffered_weights:
                # Weights never change across the grid -> single-buffer them
                # (halves their resident VMEM; matters on v7x's 64 MiB).
                return pl.BlockSpec(shape, lambda i: (0, 0),
                                    pipeline_mode=pl.Buffered(1))
            return pl.BlockSpec(shape, lambda i: (0, 0))

        return pl.pallas_call(
            kernel,
            out_shape=jax.ShapeDtypeStruct((H, B), jnp.float32),
            grid=grid,
            in_specs=[act_spec,
                      w_spec((3 * H, 3 * H)), w_spec((3 * H, 1)),
                      w_spec((H, H)), w_spec((H, 1))],
            out_specs=out_spec,
            compiler_params=pltpu.CompilerParams(
                dimension_semantics=("parallel",),
                vmem_limit_bytes=32 * 1024 * 1024),
        )

    # Prefer single-buffered resident weights; fall back if this Pallas version
    # rejects pipeline_mode=pl.Buffered(1).
    try:
        call = build_call(True)
        dummy = jnp.zeros((3 * H, B), jnp.bfloat16)
        jax.block_until_ready(call(dummy, w_qkv, b_qkv, wfc_feat, bfc_c))
    except Exception:
        call = build_call(False)

    @jax.jit
    def forward(query, key, value):
        # Feature-major, bf16, single slab: one DMA per grid step, lane axis = B.
        x_cat = jnp.concatenate([query.T, key.T, value.T],
                                axis=0).astype(jnp.bfloat16)   # (3H, B)
        out_t = call(x_cat, w_qkv, b_qkv, wfc_feat, bfc_c)     # (H, B) f32
        return out_t.T                                          # (B, H)

    return forward


def cab_reference(query, key, value, params, n_heads):
    """Pure-JAX transcription of the PyTorch forward (mask=None, eval mode)."""
    wq, bq, wk, bk, wv, bv, wfc, bfc = params
    B, H = query.shape
    D = H // n_heads
    scale = jnp.sqrt(jnp.float32(D))
    Q = query @ wq.T + bq
    K = key @ wk.T + bk
    V = value @ wv.T + bv
    Q = Q.reshape(B, n_heads, D)[..., :, None]                   # (B, nh, D, 1)
    K_T = K.reshape(B, n_heads, D)[..., :, None].swapaxes(2, 3)  # (B, nh, 1, D)
    V = V.reshape(B, n_heads, D)[..., :, None]                   # (B, nh, D, 1)
    energy = jnp.matmul(Q, K_T) / scale                          # (B, nh, D, D)
    attn = jax.nn.softmax(energy, axis=-1)
    wm = jnp.matmul(attn, V)                                     # (B, nh, D, 1)
    wm = jnp.transpose(wm, (0, 2, 1, 3)).reshape(B, n_heads * D)
    return wm @ wfc.T + bfc


def init_params(key, hid_dim):
    ks = jax.random.split(key, 8)

    def lin(kw, kb):
        w = 0.1 * jax.random.normal(kw, (hid_dim, hid_dim), jnp.float32)
        b = 0.1 * jax.random.normal(kb, (hid_dim,), jnp.float32)
        return w, b

    wq, bq = lin(ks[0], ks[1])
    wk, bk = lin(ks[2], ks[3])
    wv, bv = lin(ks[4], ks[5])
    wfc, bfc = lin(ks[6], ks[7])
    return (wq, bq, wk, bk, wv, bv, wfc, bfc)


if __name__ == "__main__":
    B, HID, NHEADS = 2, 32, 4

    root = jax.random.PRNGKey(0)
    kq, kk, kv, kp = jax.random.split(root, 4)
    query = jax.random.normal(kq, (B, HID), jnp.float32)
    key_in = jax.random.normal(kk, (B, HID), jnp.float32)
    value = jax.random.normal(kv, (B, HID), jnp.float32)
    params = init_params(kp, HID)

    fwd = make_cab_forward(B, HID, NHEADS, params)
    out = jax.block_until_ready(fwd(query, key_in, value))

    ref = jax.block_until_ready(cab_reference(query, key_in, value, params, NHEADS))
    assert out.shape == (B, HID), out.shape
    # bf16 MXU operands + approx reciprocal -> loose tolerance; structural bugs
    # (wrong permutation / softmax axis) would be O(0.3+) off.
    err = float(jnp.max(jnp.abs(out - ref)))
    assert jnp.allclose(out, ref, atol=3e-2, rtol=3e-2), ("mismatch vs reference", err)
    print("KERNEL_OK")
</pallas_src>

<mosaic_0001>
module attributes {stable_mosaic.version = 11 : i64} {
  func.func @kernel(%arg0: i32, %arg1: memref<96x2xbf16, #tpu.memory_space<vmem>>, %arg2: memref<96x96xbf16, #tpu.memory_space<vmem>>, %arg3: memref<96x1xf32, #tpu.memory_space<vmem>>, %arg4: memref<32x32xbf16, #tpu.memory_space<vmem>>, %arg5: memref<32x1xf32, #tpu.memory_space<vmem>>, %arg6: memref<32x2xf32, #tpu.memory_space<vmem>>) attributes {dimension_semantics = [#tpu.dimension_semantics<parallel>], iteration_bounds = array<i64: 1>, scalar_prefetch = 0 : i64, scratch_operands = 0 : i64, tpu.core_type = #tpu.core_type<tc>, window_params = [{transform_indices = @transform_0, window_bounds = array<i64: 96, 2>}, {pipeline_mode = #tpu.pipeline_mode<synchronous>, transform_indices = @transform_1, window_bounds = array<i64: 96, 96>}, {pipeline_mode = #tpu.pipeline_mode<synchronous>, transform_indices = @transform_2, window_bounds = array<i64: 96, 1>}, {pipeline_mode = #tpu.pipeline_mode<synchronous>, transform_indices = @transform_3, window_bounds = array<i64: 32, 32>}, {pipeline_mode = #tpu.pipeline_mode<synchronous>, transform_indices = @transform_4, window_bounds = array<i64: 32, 1>}, {transform_indices = @transform_5, window_bounds = array<i64: 32, 2>}]} {
    %c0 = arith.constant 0 : index
    %c0_0 = arith.constant 0 : index
    %0 = vector.load %arg2[%c0, %c0_0] : memref<96x96xbf16, #tpu.memory_space<vmem>>, vector<96x96xbf16>
    %c0_1 = arith.constant 0 : index
    %c0_2 = arith.constant 0 : index
    %1 = vector.load %arg1[%c0_1, %c0_2] : memref<96x2xbf16, #tpu.memory_space<vmem>>, vector<96x2xbf16>
    %cst = arith.constant dense<0.000000e+00> : vector<96x2xf32>
    %2 = tpu.matmul %0, %1, %cst {dimension_numbers = #tpu.dot_dimension_numbers<[1], [0], [0], [1], [0, 0, 1, 1], [], []>} : vector<96x96xbf16>, vector<96x2xbf16>, vector<96x2xf32> -> vector<96x2xf32>
    %c0_3 = arith.constant 0 : index
    %c0_4 = arith.constant 0 : index
    %3 = vector.load %arg3[%c0_3, %c0_4] : memref<96x1xf32, #tpu.memory_space<vmem>>, vector<96x1xf32>
    %4 = vector.broadcast %3 : vector<96x1xf32> to vector<96x2xf32>
    %5 = arith.addf %2, %4 : vector<96x2xf32>
    %6 = vector.extract_strided_slice %5 {offsets = [0, 0], sizes = [32, 2], strides = [1, 1]} : vector<96x2xf32> to vector<32x2xf32>
    %7 = vector.shape_cast %6 : vector<32x2xf32> to vector<4x8x2xf32>
    %8 = vector.extract_strided_slice %5 {offsets = [32, 0], sizes = [32, 2], strides = [1, 1]} : vector<96x2xf32> to vector<32x2xf32>
    %9 = vector.shape_cast %8 : vector<32x2xf32> to vector<4x8x2xf32>
    %10 = vector.extract_strided_slice %5 {offsets = [64, 0], sizes = [32, 2], strides = [1, 1]} : vector<96x2xf32> to vector<32x2xf32>
    %11 = vector.shape_cast %10 : vector<32x2xf32> to vector<4x8x2xf32>
    %cst_5 = arith.constant dense<0xFF800000> : vector<4x2xf32>
    %12 = vector.multi_reduction <maximumf>, %9, %cst_5 [1] : vector<4x8x2xf32> to vector<4x2xf32>
    %13 = vector.shape_cast %12 : vector<4x2xf32> to vector<4x1x2xf32>
    %cst_6 = arith.constant dense<0x7F800000> : vector<4x2xf32>
    %14 = vector.multi_reduction <minimumf>, %9, %cst_6 [1] : vector<4x8x2xf32> to vector<4x2xf32>
    %15 = vector.shape_cast %14 : vector<4x2xf32> to vector<4x1x2xf32>
    %cst_7 = arith.constant 0.000000e+00 : f32
    %16 = vector.broadcast %cst_7 : f32 to vector<4x8x2xf32>
    %17 = arith.cmpf oge, %7, %16 : vector<4x8x2xf32>
    %18 = vector.broadcast %13 : vector<4x1x2xf32> to vector<4x8x2xf32>
    %19 = arith.mulf %7, %18 : vector<4x8x2xf32>
    %20 = vector.broadcast %15 : vector<4x1x2xf32> to vector<4x8x2xf32>
    %21 = arith.mulf %7, %20 : vector<4x8x2xf32>
    %22 = arith.select %17, %19, %21 : vector<4x8x2xi1>, vector<4x8x2xf32>
    %cst_8 = arith.constant 0.000000e+00 : f32
    %23 = vector.broadcast %cst_8 : f32 to vector<4x8x2xf32>
    %cst_9 = arith.constant 0.000000e+00 : f32
    %24 = vector.broadcast %cst_9 : f32 to vector<4x8x2xf32>
    %25 = vector.extract_strided_slice %9 {offsets = [0, 0, 0], sizes = [4, 1, 2], strides = [1, 1, 1]} : vector<4x8x2xf32> to vector<4x1x2xf32>
    %26 = vector.extract_strided_slice %11 {offsets = [0, 0, 0], sizes = [4, 1, 2], strides = [1, 1, 1]} : vector<4x8x2xf32> to vector<4x1x2xf32>
    %27 = vector.broadcast %25 : vector<4x1x2xf32> to vector<4x8x2xf32>
    %28 = arith.mulf %7, %27 : vector<4x8x2xf32>
    %29 = arith.subf %28, %22 : vector<4x8x2xf32>
    %30 = math.exp %29 : vector<4x8x2xf32>
    %31 = arith.addf %23, %30 : vector<4x8x2xf32>
    %32 = vector.broadcast %26 : vector<4x1x2xf32> to vector<4x8x2xf32>
    %33 = arith.mulf %30, %32 : vector<4x8x2xf32>
    %34 = arith.addf %24, %33 : vector<4x8x2xf32>
    %35 = vector.extract_strided_slice %9 {offsets = [0, 1, 0], sizes = [4, 1, 2], strides = [1, 1, 1]} : vector<4x8x2xf32> to vector<4x1x2xf32>
    %36 = vector.extract_strided_slice %11 {offsets = [0, 1, 0], sizes = [4, 1, 2], strides = [1, 1, 1]} : vector<4x8x2xf32> to vector<4x1x2xf32>
    %37 = vector.broadcast %35 : vector<4x1x2xf32> to vector<4x8x2xf32>
    %38 = arith.mulf %7, %37 : vector<4x8x2xf32>
    %39 = arith.subf %38, %22 : vector<4x8x2xf32>
    %40 = math.exp %39 : vector<4x8x2xf32>
    %41 = arith.addf %31, %40 : vector<4x8x2xf32>
    %42 = vector.broadcast %36 : vector<4x1x2xf32> to vector<4x8x2xf32>
    %43 = arith.mulf %40, %42 : vector<4x8x2xf32>
    %44 = arith.addf %34, %43 : vector<4x8x2xf32>
    %45 = vector.extract_strided_slice %9 {offsets = [0, 2, 0], sizes = [4, 1, 2], strides = [1, 1, 1]} : vector<4x8x2xf32> to vector<4x1x2xf32>
    %46 = vector.extract_strided_slice %11 {offsets = [0, 2, 0], sizes = [4, 1, 2], strides = [1, 1, 1]} : vector<4x8x2xf32> to vector<4x1x2xf32>
    %47 = vector.broadcast %45 : vector<4x1x2xf32> to vector<4x8x2xf32>
    %48 = arith.mulf %7, %47 : vector<4x8x2xf32>
    %49 = arith.subf %48, %22 : vector<4x8x2xf32>
    %50 = math.exp %49 : vector<4x8x2xf32>
    %51 = arith.addf %41, %50 : vector<4x8x2xf32>
    %52 = vector.broadcast %46 : vector<4x1x2xf32> to vector<4x8x2xf32>
    %53 = arith.mulf %50, %52 : vector<4x8x2xf32>
    %54 = arith.addf %44, %53 : vector<4x8x2xf32>
    %55 = vector.extract_strided_slice %9 {offsets = [0, 3, 0], sizes = [4, 1, 2], strides = [1, 1, 1]} : vector<4x8x2xf32> to vector<4x1x2xf32>
    %56 = vector.extract_strided_slice %11 {offsets = [0, 3, 0], sizes = [4, 1, 2], strides = [1, 1, 1]} : vector<4x8x2xf32> to vector<4x1x2xf32>
    %57 = vector.broadcast %55 : vector<4x1x2xf32> to vector<4x8x2xf32>
    %58 = arith.mulf %7, %57 : vector<4x8x2xf32>
    %59 = arith.subf %58, %22 : vector<4x8x2xf32>
    %60 = math.exp %59 : vector<4x8x2xf32>
    %61 = arith.addf %51, %60 : vector<4x8x2xf32>
    %62 = vector.broadcast %56 : vector<4x1x2xf32> to vector<4x8x2xf32>
    %63 = arith.mulf %60, %62 : vector<4x8x2xf32>
    %64 = arith.addf %54, %63 : vector<4x8x2xf32>
    %65 = vector.extract_strided_slice %9 {offsets = [0, 4, 0], sizes = [4, 1, 2], strides = [1, 1, 1]} : vector<4x8x2xf32> to vector<4x1x2xf32>
    %66 = vector.extract_strided_slice %11 {offsets = [0, 4, 0], sizes = [4, 1, 2], strides = [1, 1, 1]} : vector<4x8x2xf32> to vector<4x1x2xf32>
    %67 = vector.broadcast %65 : vector<4x1x2xf32> to vector<4x8x2xf32>
    %68 = arith.mulf %7, %67 : vector<4x8x2xf32>
    %69 = arith.subf %68, %22 : vector<4x8x2xf32>
    %70 = math.exp %69 : vector<4x8x2xf32>
    %71 = arith.addf %61, %70 : vector<4x8x2xf32>
    %72 = vector.broadcast %66 : vector<4x1x2xf32> to vector<4x8x2xf32>
    %73 = arith.mulf %70, %72 : vector<4x8x2xf32>
    %74 = arith.addf %64, %73 : vector<4x8x2xf32>
    %75 = vector.extract_strided_slice %9 {offsets = [0, 5, 0], sizes = [4, 1, 2], strides = [1, 1, 1]} : vector<4x8x2xf32> to vector<4x1x2xf32>
    %76 = vector.extract_strided_slice %11 {offsets = [0, 5, 0], sizes = [4, 1, 2], strides = [1, 1, 1]} : vector<4x8x2xf32> to vector<4x1x2xf32>
    %77 = vector.broadcast %75 : vector<4x1x2xf32> to vector<4x8x2xf32>
    %78 = arith.mulf %7, %77 : vector<4x8x2xf32>
    %79 = arith.subf %78, %22 : vector<4x8x2xf32>
    %80 = math.exp %79 : vector<4x8x2xf32>
    %81 = arith.addf %71, %80 : vector<4x8x2xf32>
    %82 = vector.broadcast %76 : vector<4x1x2xf32> to vector<4x8x2xf32>
    %83 = arith.mulf %80, %82 : vector<4x8x2xf32>
    %84 = arith.addf %74, %83 : vector<4x8x2xf32>
    %85 = vector.extract_strided_slice %9 {offsets = [0, 6, 0], sizes = [4, 1, 2], strides = [1, 1, 1]} : vector<4x8x2xf32> to vector<4x1x2xf32>
    %86 = vector.extract_strided_slice %11 {offsets = [0, 6, 0], sizes = [4, 1, 2], strides = [1, 1, 1]} : vector<4x8x2xf32> to vector<4x1x2xf32>
    %87 = vector.broadcast %85 : vector<4x1x2xf32> to vector<4x8x2xf32>
    %88 = arith.mulf %7, %87 : vector<4x8x2xf32>
    %89 = arith.subf %88, %22 : vector<4x8x2xf32>
    %90 = math.exp %89 : vector<4x8x2xf32>
    %91 = arith.addf %81, %90 : vector<4x8x2xf32>
    %92 = vector.broadcast %86 : vector<4x1x2xf32> to vector<4x8x2xf32>
    %93 = arith.mulf %90, %92 : vector<4x8x2xf32>
    %94 = arith.addf %84, %93 : vector<4x8x2xf32>
    %95 = vector.extract_strided_slice %9 {offsets = [0, 7, 0], sizes = [4, 1, 2], strides = [1, 1, 1]} : vector<4x8x2xf32> to vector<4x1x2xf32>
    %96 = vector.extract_strided_slice %11 {offsets = [0, 7, 0], sizes = [4, 1, 2], strides = [1, 1, 1]} : vector<4x8x2xf32> to vector<4x1x2xf32>
    %97 = vector.broadcast %95 : vector<4x1x2xf32> to vector<4x8x2xf32>
    %98 = arith.mulf %7, %97 : vector<4x8x2xf32>
    %99 = arith.subf %98, %22 : vector<4x8x2xf32>
    %100 = math.exp %99 : vector<4x8x2xf32>
    %101 = arith.addf %91, %100 : vector<4x8x2xf32>
    %102 = vector.broadcast %96 : vector<4x1x2xf32> to vector<4x8x2xf32>
    %103 = arith.mulf %100, %102 : vector<4x8x2xf32>
    %104 = arith.addf %94, %103 : vector<4x8x2xf32>
    %105 = tpu.reciprocal %101 {approx = true} : vector<4x8x2xf32> -> vector<4x8x2xf32>
    %106 = arith.mulf %104, %105 : vector<4x8x2xf32>
    %107 = vector.shape_cast %106 : vector<4x8x2xf32> to vector<32x2xf32>
    %108 = arith.truncf %107 : vector<32x2xf32> to vector<32x2xbf16>
    %c0_10 = arith.constant 0 : index
    %c0_11 = arith.constant 0 : index
    %109 = vector.load %arg4[%c0_10, %c0_11] : memref<32x32xbf16, #tpu.memory_space<vmem>>, vector<32x32xbf16>
    %cst_12 = arith.constant dense<0.000000e+00> : vector<32x2xf32>
    %110 = tpu.matmul %109, %108, %cst_12 {dimension_numbers = #tpu.dot_dimension_numbers<[1], [0], [0], [1], [0, 0, 1, 1], [], []>} : vector<32x32xbf16>, vector<32x2xbf16>, vector<32x2xf32> -> vector<32x2xf32>
    %c0_13 = arith.constant 0 : index
    %c0_14 = arith.constant 0 : index
    %111 = vector.load %arg5[%c0_13, %c0_14] : memref<32x1xf32, #tpu.memory_space<vmem>>, vector<32x1xf32>
    %112 = vector.broadcast %111 : vector<32x1xf32> to vector<32x2xf32>
    %113 = arith.addf %110, %112 : vector<32x2xf32>
    %c0_15 = arith.constant 0 : index
    %c0_16 = arith.constant 0 : index
    %114 = vector.load %arg6[%c0_15, %c0_16] : memref<32x2xf32, #tpu.memory_space<vmem>>, vector<32x2xf32>
    tpu.vector_store %arg6[%c0_15, %c0_16], %113 {strides = array<i32>} : memref<32x2xf32, #tpu.memory_space<vmem>>, vector<32x2xf32>,
    return
  }
  func.func @transform_0(%arg0: i32) -> (i32, i32) {
    %c0_i32 = arith.constant 0 : i32
    %c0_i32_0 = arith.constant 0 : i32
    return %c0_i32, %arg0 : i32, i32
  }
  func.func @transform_1(%arg0: i32) -> (i32, i32) {
    %c0_i32 = arith.constant 0 : i32
    %c0_i32_0 = arith.constant 0 : i32
    %c0_i32_1 = arith.constant 0 : i32
    return %c0_i32, %c0_i32_0 : i32, i32
  }
  func.func @transform_2(%arg0: i32) -> (i32, i32) {
    %c0_i32 = arith.constant 0 : i32
    %c0_i32_0 = arith.constant 0 : i32
    %c0_i32_1 = arith.constant 0 : i32
    return %c0_i32, %c0_i32_0 : i32, i32
  }
  func.func @transform_3(%arg0: i32) -> (i32, i32) {
    %c0_i32 = arith.constant 0 : i32
    %c0_i32_0 = arith.constant 0 : i32
    %c0_i32_1 = arith.constant 0 : i32
    return %c0_i32, %c0_i32_0 : i32, i32
  }
  func.func @transform_4(%arg0: i32) -> (i32, i32) {
    %c0_i32 = arith.constant 0 : i32
    %c0_i32_0 = arith.constant 0 : i32
    %c0_i32_1 = arith.constant 0 : i32
    return %c0_i32, %c0_i32_0 : i32, i32
  }
  func.func @transform_5(%arg0: i32) -> (i32, i32) {
    %c0_i32 = arith.constant 0 : i32
    %c0_i32_0 = arith.constant 0 : i32
    return %c0_i32, %arg0 : i32, i32
  }
}

module attributes {stable_mosaic.version = 11 : i64} {
  func.func @kernel(%arg0: i32, %arg1: memref<96x2xbf16, #tpu.memory_space<vmem>>, %arg2: memref<96x96xbf16, #tpu.memory_space<vmem>>, %arg3: memref<96x1xf32, #tpu.memory_space<vmem>>, %arg4: memref<32x32xbf16, #tpu.memory_space<vmem>>, %arg5: memref<32x1xf32, #tpu.memory_space<vmem>>, %arg6: memref<32x2xf32, #tpu.memory_space<vmem>>) attributes {dimension_semantics = [#tpu.dimension_semantics<parallel>], iteration_bounds = array<i64: 1>, scalar_prefetch = 0 : i64, scratch_operands = 0 : i64, tpu.core_type = #tpu.core_type<tc>, window_params = [{transform_indices = @transform_0, window_bounds = array<i64: 96, 2>}, {pipeline_mode = #tpu.pipeline_mode<synchronous>, transform_indices = @transform_1, window_bounds = array<i64: 96, 96>}, {pipeline_mode = #tpu.pipeline_mode<synchronous>, transform_indices = @transform_2, window_bounds = array<i64: 96, 1>}, {pipeline_mode = #tpu.pipeline_mode<synchronous>, transform_indices = @transform_3, window_bounds = array<i64: 32, 32>}, {pipeline_mode = #tpu.pipeline_mode<synchronous>, transform_indices = @transform_4, window_bounds = array<i64: 32, 1>}, {transform_indices = @transform_5, window_bounds = array<i64: 32, 2>}]} {
    %c0 = arith.constant 0 : index
    %c0_0 = arith.constant 0 : index
    %0 = vector.load %arg2[%c0, %c0_0] : memref<96x96xbf16, #tpu.memory_space<vmem>>, vector<96x96xbf16>
    %c0_1 = arith.constant 0 : index
    %c0_2 = arith.constant 0 : index
    %1 = vector.load %arg1[%c0_1, %c0_2] : memref<96x2xbf16, #tpu.memory_space<vmem>>, vector<96x2xbf16>
    %cst = arith.constant dense<0.000000e+00> : vector<96x2xf32>
    %2 = tpu.matmul %0, %1, %cst {dimension_numbers = #tpu.dot_dimension_numbers<[1], [0], [0], [1], [0, 0, 1, 1], [], []>} : vector<96x96xbf16>, vector<96x2xbf16>, vector<96x2xf32> -> vector<96x2xf32>
    %c0_3 = arith.constant 0 : index
    %c0_4 = arith.constant 0 : index
    %3 = vector.load %arg3[%c0_3, %c0_4] : memref<96x1xf32, #tpu.memory_space<vmem>>, vector<96x1xf32>
    %4 = vector.broadcast %3 : vector<96x1xf32> to vector<96x2xf32>
    %5 = arith.addf %2, %4 : vector<96x2xf32>
    %6 = vector.extract_strided_slice %5 {offsets = [0, 0], sizes = [32, 2], strides = [1, 1]} : vector<96x2xf32> to vector<32x2xf32>
    %7 = vector.shape_cast %6 : vector<32x2xf32> to vector<4x8x2xf32>
    %8 = vector.extract_strided_slice %5 {offsets = [32, 0], sizes = [32, 2], strides = [1, 1]} : vector<96x2xf32> to vector<32x2xf32>
    %9 = vector.shape_cast %8 : vector<32x2xf32> to vector<4x8x2xf32>
    %10 = vector.extract_strided_slice %5 {offsets = [64, 0], sizes = [32, 2], strides = [1, 1]} : vector<96x2xf32> to vector<32x2xf32>
    %11 = vector.shape_cast %10 : vector<32x2xf32> to vector<4x8x2xf32>
    %cst_5 = arith.constant dense<0xFF800000> : vector<4x2xf32>
    %12 = vector.multi_reduction <maximumf>, %9, %cst_5 [1] : vector<4x8x2xf32> to vector<4x2xf32>
    %13 = vector.shape_cast %12 : vector<4x2xf32> to vector<4x1x2xf32>
    %cst_6 = arith.constant dense<0x7F800000> : vector<4x2xf32>
    %14 = vector.multi_reduction <minimumf>, %9, %cst_6 [1] : vector<4x8x2xf32> to vector<4x2xf32>
    %15 = vector.shape_cast %14 : vector<4x2xf32> to vector<4x1x2xf32>
    %cst_7 = arith.constant 0.000000e+00 : f32
    %16 = vector.broadcast %cst_7 : f32 to vector<4x8x2xf32>
    %17 = arith.cmpf oge, %7, %16 : vector<4x8x2xf32>
    %18 = vector.broadcast %13 : vector<4x1x2xf32> to vector<4x8x2xf32>
    %19 = arith.mulf %7, %18 : vector<4x8x2xf32>
    %20 = vector.broadcast %15 : vector<4x1x2xf32> to vector<4x8x2xf32>
    %21 = arith.mulf %7, %20 : vector<4x8x2xf32>
    %22 = arith.select %17, %19, %21 : vector<4x8x2xi1>, vector<4x8x2xf32>
    %cst_8 = arith.constant 0.000000e+00 : f32
    %23 = vector.broadcast %cst_8 : f32 to vector<4x8x2xf32>
    %cst_9 = arith.constant 0.000000e+00 : f32
    %24 = vector.broadcast %cst_9 : f32 to vector<4x8x2xf32>
    %25 = vector.extract_strided_slice %9 {offsets = [0, 0, 0], sizes = [4, 1, 2], strides = [1, 1, 1]} : vector<4x8x2xf32> to vector<4x1x2xf32>
    %26 = vector.extract_strided_slice %11 {offsets = [0, 0, 0], sizes = [4, 1, 2], strides = [1, 1, 1]} : vector<4x8x2xf32> to vector<4x1x2xf32>
    %27 = vector.broadcast %25 : vector<4x1x2xf32> to vector<4x8x2xf32>
    %28 = arith.mulf %7, %27 : vector<4x8x2xf32>
    %29 = arith.subf %28, %22 : vector<4x8x2xf32>
    %30 = math.exp %29 : vector<4x8x2xf32>
    %31 = arith.addf %23, %30 : vector<4x8x2xf32>
    %32 = vector.broadcast %26 : vector<4x1x2xf32> to vector<4x8x2xf32>
    %33 = arith.mulf %30, %32 : vector<4x8x2xf32>
    %34 = arith.addf %24, %33 : vector<4x8x2xf32>
    %35 = vector.extract_strided_slice %9 {offsets = [0, 1, 0], sizes = [4, 1, 2], strides = [1, 1, 1]} : vector<4x8x2xf32> to vector<4x1x2xf32>
    %36 = vector.extract_strided_slice %11 {offsets = [0, 1, 0], sizes = [4, 1, 2], strides = [1, 1, 1]} : vector<4x8x2xf32> to vector<4x1x2xf32>
    %37 = vector.broadcast %35 : vector<4x1x2xf32> to vector<4x8x2xf32>
    %38 = arith.mulf %7, %37 : vector<4x8x2xf32>
    %39 = arith.subf %38, %22 : vector<4x8x2xf32>
    %40 = math.exp %39 : vector<4x8x2xf32>
    %41 = arith.addf %31, %40 : vector<4x8x2xf32>
    %42 = vector.broadcast %36 : vector<4x1x2xf32> to vector<4x8x2xf32>
    %43 = arith.mulf %40, %42 : vector<4x8x2xf32>
    %44 = arith.addf %34, %43 : vector<4x8x2xf32>
    %45 = vector.extract_strided_slice %9 {offsets = [0, 2, 0], sizes = [4, 1, 2], strides = [1, 1, 1]} : vector<4x8x2xf32> to vector<4x1x2xf32>
    %46 = vector.extract_strided_slice %11 {offsets = [0, 2, 0], sizes = [4, 1, 2], strides = [1, 1, 1]} : vector<4x8x2xf32> to vector<4x1x2xf32>
    %47 = vector.broadcast %45 : vector<4x1x2xf32> to vector<4x8x2xf32>
    %48 = arith.mulf %7, %47 : vector<4x8x2xf32>
    %49 = arith.subf %48, %22 : vector<4x8x2xf32>
    %50 = math.exp %49 : vector<4x8x2xf32>
    %51 = arith.addf %41, %50 : vector<4x8x2xf32>
    %52 = vector.broadcast %46 : vector<4x1x2xf32> to vector<4x8x2xf32>
    %53 = arith.mulf %50, %52 : vector<4x8x2xf32>
    %54 = arith.addf %44, %53 : vector<4x8x2xf32>
    %55 = vector.extract_strided_slice %9 {offsets = [0, 3, 0], sizes = [4, 1, 2], strides = [1, 1, 1]} : vector<4x8x2xf32> to vector<4x1x2xf32>
    %56 = vector.extract_strided_slice %11 {offsets = [0, 3, 0], sizes = [4, 1, 2], strides = [1, 1, 1]} : vector<4x8x2xf32> to vector<4x1x2xf32>
    %57 = vector.broadcast %55 : vector<4x1x2xf32> to vector<4x8x2xf32>
    %58 = arith.mulf %7, %57 : vector<4x8x2xf32>
    %59 = arith.subf %58, %22 : vector<4x8x2xf32>
    %60 = math.exp %59 : vector<4x8x2xf32>
    %61 = arith.addf %51, %60 : vector<4x8x2xf32>
    %62 = vector.broadcast %56 : vector<4x1x2xf32> to vector<4x8x2xf32>
    %63 = arith.mulf %60, %62 : vector<4x8x2xf32>
    %64 = arith.addf %54, %63 : vector<4x8x2xf32>
    %65 = vector.extract_strided_slice %9 {offsets = [0, 4, 0], sizes = [4, 1, 2], strides = [1, 1, 1]} : vector<4x8x2xf32> to vector<4x1x2xf32>
    %66 = vector.extract_strided_slice %11 {offsets = [0, 4, 0], sizes = [4, 1, 2], strides = [1, 1, 1]} : vector<4x8x2xf32> to vector<4x1x2xf32>
    %67 = vector.broadcast %65 : vector<4x1x2xf32> to vector<4x8x2xf32>
    %68 = arith.mulf %7, %67 : vector<4x8x2xf32>
    %69 = arith.subf %68, %22 : vector<4x8x2xf32>
    %70 = math.exp %69 : vector<4x8x2xf32>
    %71 = arith.addf %61, %70 : vector<4x8x2xf32>
    %72 = vector.broadcast %66 : vector<4x1x2xf32> to vector<4x8x2xf32>
    %73 = arith.mulf %70, %72 : vector<4x8x2xf32>
    %74 = arith.addf %64, %73 : vector<4x8x2xf32>
    %75 = vector.extract_strided_slice %9 {offsets = [0, 5, 0], sizes = [4, 1, 2], strides = [1, 1, 1]} : vector<4x8x2xf32> to vector<4x1x2xf32>
    %76 = vector.extract_strided_slice %11 {offsets = [0, 5, 0], sizes = [4, 1, 2], strides = [1, 1, 1]} : vector<4x8x2xf32> to vector<4x1x2xf32>
    %77 = vector.broadcast %75 : vector<4x1x2xf32> to vector<4x8x2xf32>
    %78 = arith.mulf %7, %77 : vector<4x8x2xf32>
    %79 = arith.subf %78, %22 : vector<4x8x2xf32>
    %80 = math.exp %79 : vector<4x8x2xf32>
    %81 = arith.addf %71, %80 : vector<4x8x2xf32>
    %82 = vector.broadcast %76 : vector<4x1x2xf32> to vector<4x8x2xf32>
    %83 = arith.mulf %80, %82 : vector<4x8x2xf32>
    %84 = arith.addf %74, %83 : vector<4x8x2xf32>
    %85 = vector.extract_strided_slice %9 {offsets = [0, 6, 0], sizes = [4, 1, 2], strides = [1, 1, 1]} : vector<4x8x2xf32> to vector<4x1x2xf32>
    %86 = vector.extract_strided_slice %11 {offsets = [0, 6, 0], sizes = [4, 1, 2], strides = [1, 1, 1]} : vector<4x8x2xf32> to vector<4x1x2xf32>
    %87 = vector.broadcast %85 : vector<4x1x2xf32> to vector<4x8x2xf32>
    %88 = arith.mulf %7, %87 : vector<4x8x2xf32>
    %89 = arith.subf %88, %22 : vector<4x8x2xf32>
    %90 = math.exp %89 : vector<4x8x2xf32>
    %91 = arith.addf %81, %90 : vector<4x8x2xf32>
    %92 = vector.broadcast %86 : vector<4x1x2xf32> to vector<4x8x2xf32>
    %93 = arith.mulf %90, %92 : vector<4x8x2xf32>
    %94 = arith.addf %84, %93 : vector<4x8x2xf32>
    %95 = vector.extract_strided_slice %9 {offsets = [0, 7, 0], sizes = [4, 1, 2], strides = [1, 1, 1]} : vector<4x8x2xf32> to vector<4x1x2xf32>
    %96 = vector.extract_strided_slice %11 {offsets = [0, 7, 0], sizes = [4, 1, 2], strides = [1, 1, 1]} : vector<4x8x2xf32> to vector<4x1x2xf32>
    %97 = vector.broadcast %95 : vector<4x1x2xf32> to vector<4x8x2xf32>
    %98 = arith.mulf %7, %97 : vector<4x8x2xf32>
    %99 = arith.subf %98, %22 : vector<4x8x2xf32>
    %100 = math.exp %99 : vector<4x8x2xf32>
    %101 = arith.addf %91, %100 : vector<4x8x2xf32>
    %102 = vector.broadcast %96 : vector<4x1x2xf32> to vector<4x8x2xf32>
    %103 = arith.mulf %100, %102 : vector<4x8x2xf32>
    %104 = arith.addf %94, %103 : vector<4x8x2xf32>
    %105 = tpu.reciprocal %101 {approx = true} : vector<4x8x2xf32> -> vector<4x8x2xf32>
    %106 = arith.mulf %104, %105 : vector<4x8x2xf32>
    %107 = vector.shape_cast %106 : vector<4x8x2xf32> to vector<32x2xf32>
    %108 = arith.truncf %107 : vector<32x2xf32> to vector<32x2xbf16>
    %c0_10 = arith.constant 0 : index
    %c0_11 = arith.constant 0 : index
    %109 = vector.load %arg4[%c0_10, %c0_11] : memref<32x32xbf16, #tpu.memory_space<vmem>>, vector<32x32xbf16>
    %cst_12 = arith.constant dense<0.000000e+00> : vector<32x2xf32>
    %110 = tpu.matmul %109, %108, %cst_12 {dimension_numbers = #tpu.dot_dimension_numbers<[1], [0], [0], [1], [0, 0, 1, 1], [], []>} : vector<32x32xbf16>, vector<32x2xbf16>, vector<32x2xf32> -> vector<32x2xf32>
    %c0_13 = arith.constant 0 : index
    %c0_14 = arith.constant 0 : index
    %111 = vector.load %arg5[%c0_13, %c0_14] : memref<32x1xf32, #tpu.memory_space<vmem>>, vector<32x1xf32>
    %112 = vector.broadcast %111 : vector<32x1xf32> to vector<32x2xf32>
    %113 = arith.addf %110, %112 : vector<32x2xf32>
    %c0_15 = arith.constant 0 : index
    %c0_16 = arith.constant 0 : index
    %114 = vector.load %arg6[%c0_15, %c0_16] : memref<32x2xf32, #tpu.memory_space<vmem>>, vector<32x2xf32>
    tpu.vector_store %arg6[%c0_15, %c0_16], %113 {strides = array<i32>} : memref<32x2xf32, #tpu.memory_space<vmem>>, vector<32x2xf32>,
    return
  }
  func.func @transform_0(%arg0: i32) -> (i32, i32) {
    %c0_i32 = arith.constant 0 : i32
    %c0_i32_0 = arith.constant 0 : i32
    return %c0_i32, %arg0 : i32, i32
  }
  func.func @transform_1(%arg0: i32) -> (i32, i32) {
    %c0_i32 = arith.constant 0 : i32
    %c0_i32_0 = arith.constant 0 : i32
    %c0_i32_1 = arith.constant 0 : i32
    return %c0_i32, %c0_i32_0 : i32, i32
  }
  func.func @transform_2(%arg0: i32) -> (i32, i32) {
    %c0_i32 = arith.constant 0 : i32
    %c0_i32_0 = arith.constant 0 : i32
    %c0_i32_1 = arith.constant 0 : i32
    return %c0_i32, %c0_i32_0 : i32, i32
  }
  func.func @transform_3(%arg0: i32) -> (i32, i32) {
    %c0_i32 = arith.constant 0 : i32
    %c0_i32_0 = arith.constant 0 : i32
    %c0_i32_1 = arith.constant 0 : i32
    return %c0_i32, %c0_i32_0 : i32, i32
  }
  func.func @transform_4(%arg0: i32) -> (i32, i32) {
    %c0_i32 = arith.constant 0 : i32
    %c0_i32_0 = arith.constant 0 : i32
    %c0_i32_1 = arith.constant 0 : i32
    return %c0_i32, %c0_i32_0 : i32, i32
  }
  func.func @transform_5(%arg0: i32) -> (i32, i32) {
    %c0_i32 = arith.constant 0 : i32
    %c0_i32_0 = arith.constant 0 : i32
    return %c0_i32, %arg0 : i32, i32
  }
}

</mosaic_0001>

<bundles_post_ra>
// kernel: tpu_custom_call.1
= control target key start
LH: loop header
LB: loop body
LE: loop exit
PB: predicated region body
PF: predicated region fallthrough
CT: control target
= control target key end

     0   :  { %v850_v1 = vmov 0   ;;  %vm183_vm0 = vcmask 785408   ;;  %vm241_vm1 = vcmask 15360   ;;  %vm650_vm6 = vcmask 261120   ;;  %s1218_s0 = inlined_call_operand.vmem [shape: bf16[96,2], index: 0, kind: input, shape index: {}]   ;;  %s1219_s2 = inlined_call_operand.vmem [shape: f32[96,1], index: 2, kind: input, shape index: {}]   ;;  %s1220_s1 = inlined_call_operand.vmem [shape: bf16[96,96], index: 1, kind: input, shape index: {}]   ;;  %s1221_s4 = inlined_call_operand.vmem [shape: f32[32,1], index: 4, kind: input, shape index: {}]   ;;  %s1222_s3 = inlined_call_operand.vmem [shape: bf16[32,32], index: 3, kind: input, shape index: {}]   ;;  %s1223_s5 = inlined_call_operand.vmem [shape: f32[32,2], index: 5, kind: output, shape index: {}]  }
   0x1   :  { %v759_v0 = vld [vmem:[%s1218_s0 + $0x28] sm:$0xff]  ;;  %775 = vset.pattern.permute.xlu0 %v850_v1  ;;  %776 = vset.pattern.permute.xlu1 %v850_v1  ;;  %v51_v2 = vld [vmem:[%s1219_s2 + $0x30] sm:$0xff]  ;;  %v758_v3 = vld [vmem:[%s1218_s0 + $0x20] sm:$0xff] }
   0x2   :  { %777 = vset.pattern.permute.xlu2 %v850_v1  ;;  %762 = vmatpush.bf16.msra.mxu2 %v759_v0  ;;  %v49_v4 = vld [vmem:[%s1219_s2 + $0x20] sm:$0xff]  ;;  %v757_v5 = vld [vmem:[%s1218_s0 + $0x18] sm:$0xff]  ;;  %v50_v7 = vld [vmem:[%s1219_s2 + $0x28] sm:$0xff] }
   0x3   :  { %763 = vmatpush.bf16.msra.mxu3 %v759_v0  ;;  %204 = vmatpush.bf16.msra.mxu0 %v759_v0  ;;  %v52_v6 = vld [vmem:[%s1219_s2 + $0x38] sm:$0xff]  ;;  %v756_v8 = vld [vmem:[%s1218_s0 + $0x10] sm:$0xff]  ;;  %v755_v10 = vld [vmem:[%s1218_s0 + $0x8] sm:$0xff] }
   0x4   :  { %89 = vperm.xlu0 %775, %v51_v2   ;;  %79 = vperm.xlu1 %776, %v49_v4   ;;  %v47_v9 = vld [vmem:[%s1219_s2 + $0x10] sm:$0xff]  ;;  %v45_v11 = vld [vmem:[%s1219_s2] sm:$0xff]  ;;  %v46_v12 = vld [vmem:[%s1219_s2 + $0x8] sm:$0xff] }
   0x5   :  { %69 = vperm.xlu2 %777, %v47_v9   ;;  %v48_v13 = vld [vmem:[%s1219_s2 + $0x18] sm:$0xff]  ;;  %v754_v14 = vld [vmem:[%s1218_s0] sm:$0xff]  ;;  %v750_v15 = vld [vmem:[%s1220_s1 + $0x10] sm:$0xff] }
   0x6   :  { %764 = vmatpush.bf16.msra.mxu2 %v758_v3  ;;  %v752_v16 = vld [vmem:[%s1220_s1 + $0x20] sm:$0xff]  ;;  %v56_v18 = vld [vmem:[%s1219_s2 + $0x58] sm:$0xff]  ;;  %v55_v20 = vld [vmem:[%s1219_s2 + $0x50] sm:$0xff] }
   0x7   :  { %765 = vmatpush.bf16.msra.mxu3 %v758_v3  ;;  %205 = vmatpush.bf16.msra.mxu0 %v758_v3  ;;  %v748_v17 = vld [vmem:[%s1220_s1] sm:$0xff]  ;;  %v617_v22 = vld [vmem:[%s1221_s4 + $0x8] sm:$0xff]  ;;  %v751_v24 = vld [vmem:[%s1220_s1 + $0x18] sm:$0xff] }
   0x8   :  { %v53_v19 = vld [vmem:[%s1219_s2 + $0x40] sm:$0xff]  ;;  %v54_v23 = vld [vmem:[%s1219_s2 + $0x48] sm:$0xff]  ;;  %v619_v27 = vld [vmem:[%s1221_s4 + $0x18] sm:$0xff] }
   0x9   :  { %v616_v21 = vld [vmem:[%s1221_s4] sm:$0xff]  ;;  %v753_v25 = vld [vmem:[%s1220_s1 + $0x28] sm:$0xff]  ;;  %v618_v28 = vld [vmem:[%s1221_s4 + $0x10] sm:$0xff] }
   0xa   :  { %766 = vmatpush.bf16.msra.mxu2 %v757_v5  ;;  %v749_v26 = vld [vmem:[%s1220_s1 + $0x8] sm:$0xff] }
   0xb   :  { %767 = vmatpush.bf16.msra.mxu3 %v757_v5  ;;  %206 = vmatpush.bf16.msra.mxu0 %v757_v5 }
   0xc   :  { %94 = vperm.xlu0 %775, %v52_v6   ;;  %84 = vperm.xlu1 %776, %v50_v7  }
   0xd   :  { %74 = vperm.xlu2 %777, %v48_v13  }
   0xe   :  { %768 = vmatpush.bf16.msra.mxu2 %v756_v8 }
   0xf   :  { %769 = vmatpush.bf16.msra.mxu3 %v756_v8  ;;  %207 = vmatpush.bf16.msra.mxu0 %v756_v8 }
  0x12   :  { %770 = vmatpush.bf16.msra.mxu2 %v755_v10 }
  0x13   :  { %771 = vmatpush.bf16.msra.mxu3 %v755_v10  ;;  %208 = vmatpush.bf16.msra.mxu0 %v755_v10 }
  0x14   :  { %59 = vperm.xlu0 %775, %v45_v11   ;;  %64 = vperm.xlu1 %776, %v46_v12  }
  0x15   :  { %109 = vperm.xlu2 %777, %v55_v20  }
  0x16   :  { %772 = vmatpush.bf16.msra.mxu2 %v754_v14 }
  0x17   :  { %773 = vmatpush.bf16.msra.mxu3 %v754_v14  ;;  %209 = vmatpush.bf16.msra.mxu0 %v754_v14 }
  0x19   :  { %734 = vmatmul.msk.bf16.vlgmr.msra.gmra.mxu2 %vm183_vm0, %v750_v15 }
  0x1a   :  { %736 = vmatmul.msk.bf16.vlgmr.msra.gmra.mxu3 %vm183_vm0, %v752_v16  ;;  %732 = vmatmul.msk.bf16.vlgmr.msra.gmra.mxu0 %vm183_vm0, %v748_v17 }
  0x1c   :  { %114 = vperm.xlu0 %775, %v56_v18   ;;  %99 = vperm.xlu1 %776, %v53_v19  }
  0x1d   :  { %104 = vperm.xlu2 %777, %v54_v23  }
  0x24   :  { %622 = vperm.xlu0 %775, %v616_v21   ;;  %627 = vperm.xlu1 %776, %v617_v22  }
  0x25   :  { %632 = vperm.xlu2 %777, %v618_v28  }
  0x29   :  { %735 = vmatmul.msk.bf16.gmra.mxu2 %vm183_vm0, %v751_v24 }
  0x2a   :  { %737 = vmatmul.msk.bf16.gmra.mxu3 %vm183_vm0, %v753_v25  ;;  %733 = vmatmul.msk.bf16.gmra.mxu0 %vm183_vm0, %v749_v26 }
  0x2c   :  { %637 = vperm.xlu0 %775, %v619_v27  }
  0x5f   :  { %v70_v30 = vpop.permute.xlu2 %69 }
  0x67   :  { %v75_v34 = vpop.permute.xlu2 %74 }
  0x6f   :  { %v110_v49 = vpop.permute.xlu2 %109 }
  0x76   :  { %v80_v29 = vpop.permute.xlu1 %79  ;;  %v90_v31 = vpop.permute.xlu0 %89 }
  0x77   :  { %v105_v9 = vpop.permute.xlu2 %104 }
  0x7e   :  { %v85_v33 = vpop.permute.xlu1 %84  ;;  %v95_v41 = vpop.permute.xlu0 %94 }
  0x86   :  { %v65_v45 = vpop.permute.xlu1 %64  ;;  %v60_v58 = vpop.permute.xlu0 %59 }
  0x8e   :  { %v100_v3 = vpop.permute.xlu1 %99 }
  0x97   :  { %v211_v32 = vpop.f32.mrf.mxu0 }
  0x98   :  { %v983_v63 = vadd.f32 %v211_v32, %v60_v58 }
  0x9a   :  { %vm298_vm4 = vcmp.ge.f32.partialorder %v983_v63, 0.0 }
  0x9c   :  { %v221_v35 = vpop.f32.mrf.mxu2 }
  0x9d   :  { %v231_v36 = vpop.f32.mrf.mxu3  ;;  %v971_v37 = vadd.f32 %v221_v35, %v80_v29 }
  0x9e   :  { %v996_v8 = vadd.f32 %v231_v36, %v100_v3  ;;  %v115_v36 = vpop.permute.xlu0 %114 }
  0x9f   :  { %v213_v38 = vpop.f32.mrf.mxu0  ;;  %v242_v39 = vsel %vm241_vm1, %v971_v37, -inf  ;;  %v270_v48 = vsel %vm241_vm1, %v971_v37, inf }
  0xa0   :  { %v243_v40 = vrot.slane %v242_v39, 4  ;;  %v271_v50 = vrot.slane %v270_v48, 4  ;;  %v999_v14 = vadd.f32 %v213_v38, %v65_v45 }
  0xa2   :  { %v244_v42 = vmax.f32 %v242_v39, %v243_v40  ;;  %v272_v54 = vmin.f32 %v270_v48, %v271_v50  ;;  %vm299_vm5 = vcmp.ge.f32.partialorder %v999_v14, 0.0 }
  0xa4   :  { %v223_v43 = vpop.f32.mrf.mxu2  ;;  %v245_v47 = vrot.slane %v244_v42, 2  ;;  %v273_v57 = vrot.slane %v272_v54, 2 }
  0xa5   :  { %v233_v44 = vpop.f32.mrf.mxu3  ;;  %v975_v46 = vadd.f32 %v223_v43, %v85_v33 }
  0xa6   :  { %v246_v55 = vmax.f32 %v244_v42, %v245_v47  ;;  %v987_v2 = vmin.f32 %v272_v54, %v273_v57  ;;  %v1001_v15 = vadd.f32 %v233_v44, %v105_v9 }
  0xa7   :  { %v216_v51 = vpop.f32.mrf.mxu0  ;;  %v249_v52 = vsel %vm241_vm1, %v975_v46, -inf }
  0xa8   :  { %v250_v53 = vrot.slane %v249_v52, 4  ;;  %v247_v62 = vrot.slane %v246_v55, 1  ;;  %v985_v0 = vadd.f32 %v216_v51, %v70_v30  ;;  %v275_v21 = vrot.slane %v987_v2, 1 }
  0xaa   :  { %v251_v56 = vmax.f32 %v249_v52, %v250_v53  ;;  %v1004_v17 = vmax.f32 %v246_v55, %v247_v62  ;;  %vm300_vm2 = vcmp.ge.f32.partialorder %v985_v0, 0.0 }
  0xac   :  { %v226_v59 = vpop.f32.mrf.mxu2  ;;  %v252_v1 = vrot.slane %v251_v56, 2 }
  0xad   :  { %v236_v60 = vpop.f32.mrf.mxu3  ;;  %v981_v61 = vadd.f32 %v226_v59, %v90_v31 }
  0xae   :  { %v989_v4 = vadd.f32 %v236_v60, %v110_v49  ;;  %v1006_v20 = vmax.f32 %v251_v56, %v252_v1 }
  0xaf   :  { %v256_v5 = vsel %vm241_vm1, %v981_v61, -inf  ;;  %v284_v6 = vsel %vm241_vm1, %v981_v61, inf  ;;  %v316_v7 = vperm.slane %v981_v61, 0  ;;  %v218_v10 = vpop.f32.mrf.mxu0  ;;  %v352_v13 = vperm.slane %v981_v61, 1 }
  0xb0   :  { %v257_v11 = vrot.slane %v256_v5, 4  ;;  %v285_v12 = vrot.slane %v284_v6, 4  ;;  %v388_v16 = vperm.slane %v981_v61, 2  ;;  %v1009_v22 = vadd.f32 %v218_v10, %v75_v34 }
  0xb1   :  { %v320_v23 = vmul.f32 %v316_v7, %v985_v0  ;;  %v340_v24 = vperm.slane %v989_v4, 0  ;;  %v376_v25 = vperm.slane %v989_v4, 1  ;;  %v356_v30 = vmul.f32 %v352_v13, %v985_v0 }
  0xb2   :  { %v258_v18 = vmax.f32 %v256_v5, %v257_v11  ;;  %v286_v19 = vmin.f32 %v284_v6, %v285_v12  ;;  %v412_v31 = vperm.slane %v989_v4, 2  ;;  %v392_v33 = vmul.f32 %v388_v16, %v985_v0 }
  0xb3   :  { %v424_v34 = vperm.slane %v981_v61, 3  ;;  %v460_v35 = vperm.slane %v981_v61, 4  ;;  %v448_v40 = vperm.slane %v989_v4, 3  ;;  %v496_v42 = vperm.slane %v981_v61, 5 }
  0xb4   :  { %v228_v26 = vpop.f32.mrf.mxu2  ;;  %v259_v28 = vrot.slane %v258_v18, 2  ;;  %v287_v29 = vrot.slane %v286_v19, 2  ;;  %v484_v54 = vperm.slane %v989_v4, 4  ;;  %v520_v1 = vperm.slane %v989_v4, 5 }
  0xb5   :  { %v238_v27 = vpop.f32.mrf.mxu3  ;;  %v1017_v32 = vadd.f32 %v228_v26, %v95_v41  ;;  %v428_v52 = vmul.f32 %v424_v34, %v985_v0  ;;  %v464_v53 = vmul.f32 %v460_v35, %v985_v0  ;;  %v500_v62 = vmul.f32 %v496_v42, %v985_v0 }
  0xb6   :  { %v260_v38 = vmax.f32 %v258_v18, %v259_v28  ;;  %v288_v39 = vmin.f32 %v286_v19, %v287_v29  ;;  %v1024_v43 = vadd.f32 %v238_v27, %v115_v36  ;;  %vm301_vm3 = vcmp.ge.f32.partialorder %v1009_v22, 0.0 }
  0xb7   :  { %v263_v44 = vsel %vm241_vm1, %v1017_v32, -inf  ;;  %v291_v41 = vsel %vm241_vm1, %v1017_v32, inf  ;;  %v317_v45 = vperm.slane %v1017_v32, 0  ;;  %v353_v51 = vperm.slane %v1017_v32, 1 }
  0xb8   :  { %v261_v47 = vrot.slane %v260_v38, 1  ;;  %v264_v48 = vrot.slane %v263_v44, 4  ;;  %v289_v49 = vrot.slane %v288_v39, 1  ;;  %v292_v50 = vrot.slane %v291_v41, 4 }
  0xb9   :  { %v321_v59 = vmul.f32 %v317_v45, %v1009_v22  ;;  %v341_v60 = vperm.slane %v1024_v43, 0  ;;  %v357_v9 = vmul.f32 %v353_v51, %v1009_v22  ;;  %v377_v10 = vperm.slane %v1024_v43, 1 }
  0xba   :  { %v262_v55 = vmax.f32 %v260_v38, %v261_v47  ;;  %v265_v56 = vmax.f32 %v263_v44, %v264_v48  ;;  %v290_v57 = vmin.f32 %v288_v39, %v289_v49  ;;  %v293_v58 = vmin.f32 %v291_v41, %v292_v50 }
  0xbb   :  { %v389_v11 = vperm.slane %v1017_v32, 2  ;;  %v425_v12 = vperm.slane %v1017_v32, 3  ;;  %v461_v19 = vperm.slane %v1017_v32, 4  ;;  %v497_v38 = vperm.slane %v1017_v32, 5 }
  0xbc   :  { %v266_v3 = vrot.slane %v265_v56, 2  ;;  %v294_v5 = vrot.slane %v293_v58, 2  ;;  %v304_v6 = vmul.f32 %v262_v55, %v985_v0  ;;  %v308_v7 = vmul.f32 %v290_v57, %v985_v0 }
  0xbd   :  { %v393_v44 = vmul.f32 %v389_v11, %v1009_v22  ;;  %v532_v49 = vperm.slane %v981_v61, 6  ;;  %v465_v55 = vmul.f32 %v461_v19, %v1009_v22 }
  0xbe   :  { %v267_v13 = vmax.f32 %v265_v56, %v266_v3  ;;  %v295_v16 = vmin.f32 %v293_v58, %v294_v5  ;;  %v1048_v18 = vsel %vm300_vm2, %v304_v6, %v308_v7  ;;  %v501_v56 = vmul.f32 %v497_v38, %v1009_v22 }
  0xbf   :  { %v324_v26 = vsub.f32 %v320_v23, %v1048_v18  ;;  %v360_v27 = vsub.f32 %v356_v30, %v1048_v18  ;;  %v396_v28 = vsub.f32 %v392_v33, %v1048_v18  ;;  %v432_v29 = vsub.f32 %v428_v52, %v1048_v18 }
  0xc0   :  { %v268_v34 = vrot.slane %v267_v13, 1  ;;  %v296_v35 = vrot.slane %v295_v16, 1  ;;  %v468_v36 = vsub.f32 %v464_v53, %v1048_v18  ;;  %v413_v23 = vperm.slane %v1024_v43, 2 }
  0xc1   :  { %v330_v39 = vmul.f32 1.442695, %v324_v26  ;;  %v366_v42 = vmul.f32 1.442695, %v360_v27  ;;  %v402_v41 = vmul.f32 1.442695, %v396_v28  ;;  %v504_v48 = vsub.f32 %v500_v62, %v1048_v18 }
  0xc2   :  { %v269_v45 = vmax.f32 %v267_v13, %v268_v34  ;;  %v297_v47 = vmin.f32 %v295_v16, %v296_v35  ;;  %v438_v30 = vmul.f32 1.442695, %v432_v29  ;;  %v474_v33 = vmul.f32 1.442695, %v468_v36 }
  0xc3   :  { %778 = vpow2.f32 %v330_v39  ;;  %v533_v52 = vperm.slane %v1017_v32, 6  ;;  %v429_v53 = vmul.f32 %v425_v12, %v1009_v22  ;;  %v510_v58 = vmul.f32 1.442695, %v504_v48 }
  0xc4   :  { %v305_v50 = vmul.f32 %v269_v45, %v1009_v22  ;;  %v309_v51 = vmul.f32 %v297_v47, %v1009_v22  ;;  %780 = vpow2.f32 %v366_v42  ;;  %v536_v62 = vmul.f32 %v532_v49, %v985_v0 }
  0xc5   :  { %782 = vpow2.f32 %v402_v41  ;;  %v537_v13 = vmul.f32 %v533_v52, %v1009_v22  ;;  %v568_v45 = vperm.slane %v981_v61, 7  ;;  %v449_v48 = vperm.slane %v1024_v43, 3 }
  0xc6   :  { %v1069_v57 = vsel %vm301_vm3, %v305_v50, %v309_v51  ;;  %784 = vpow2.f32 %v438_v30  ;;  %v540_v28 = vsub.f32 %v536_v62, %v1048_v18  ;;  %v485_v62 = vperm.slane %v1024_v43, 4 }
  0xc7   :  { %v325_v3 = vsub.f32 %v321_v59, %v1069_v57  ;;  %v361_v5 = vsub.f32 %v357_v9, %v1069_v57  ;;  %v397_v6 = vsub.f32 %v393_v44, %v1069_v57  ;;  %v433_v7 = vsub.f32 %v429_v53, %v1069_v57 }
  0xc8   :  { %v469_v11 = vsub.f32 %v465_v55, %v1069_v57  ;;  %786 = vpow2.f32 %v474_v33  ;;  %v505_v12 = vsub.f32 %v501_v56, %v1069_v57  ;;  %v541_v39 = vsub.f32 %v537_v13, %v1069_v57 }
  0xc9   :  { %v779_v16 = vpop.eup %778  ;;  %v332_v19 = vmul.f32 1.442695, %v325_v3  ;;  %v368_v26 = vmul.f32 1.442695, %v361_v5  ;;  %v404_v27 = vmul.f32 1.442695, %v397_v6  ;;  %788 = vpow2.f32 %v510_v58 }
  0xca   :  { %v781_v59 = vpop.eup %780  ;;  %v344_v9 = vmul.f32 %v779_v16, %v340_v24  ;;  %v440_v29 = vmul.f32 1.442695, %v433_v7  ;;  %v476_v34 = vmul.f32 1.442695, %v469_v11  ;;  %v512_v41 = vmul.f32 1.442695, %v505_v12 }
  0xcb   :  { %v783_v35 = vpop.eup %782  ;;  %790 = vpow2.f32 %v332_v19  ;;  %v372_v36 = vadd.f32 %v781_v59, %v779_v16  ;;  %v380_v38 = vmul.f32 %v781_v59, %v376_v25  ;;  %v546_v30 = vmul.f32 1.442695, %v540_v28 }
  0xcc   :  { %v785_v42 = vpop.eup %784  ;;  %792 = vpow2.f32 %v368_v26  ;;  %v416_v44 = vmul.f32 %v783_v35, %v412_v31  ;;  %v569_v25 = vperm.slane %v1017_v32, 7  ;;  %v572_v49 = vmul.f32 %v568_v45, %v985_v0 }
  0xcd   :  { %v384_v24 = vadd.f32 %v380_v38, %v344_v9  ;;  %794 = vpow2.f32 %v404_v27  ;;  %v408_v47 = vadd.f32 %v783_v35, %v372_v36  ;;  %v548_v52 = vmul.f32 1.442695, %v541_v39 }
  0xce   :  { %v787_v33 = vpop.eup %786  ;;  %796 = vpow2.f32 %v440_v29  ;;  %v452_v61 = vmul.f32 %v785_v42, %v448_v40  ;;  %v573_v53 = vmul.f32 %v569_v25, %v1009_v22  ;;  %v576_v55 = vsub.f32 %v572_v49, %v1048_v18 }
  0xcf   :  { %v420_v50 = vadd.f32 %v416_v44, %v384_v24  ;;  %v444_v51 = vadd.f32 %v785_v42, %v408_v47  ;;  %798 = vpow2.f32 %v476_v34  ;;  %v789_v31 = vpop.eup %788  ;;  %v521_v32 = vperm.slane %v1024_v43, 5 }
  0xd0   :  { %800 = vpow2.f32 %v512_v41  ;;  %v577_v6 = vsub.f32 %v573_v53, %v1069_v57  ;;  %v582_v40 = vmul.f32 1.442695, %v576_v55  ;;  %v556_v18 = vperm.slane %v989_v4, 6 }
  0xd1   :  { %v791_v56 = vpop.eup %790  ;;  %v480_v58 = vadd.f32 %v787_v33, %v444_v51  ;;  %802 = vpow2.f32 %v546_v30  ;;  %v456_v5 = vadd.f32 %v452_v61, %v420_v50  ;;  %v488_v13 = vmul.f32 %v787_v33, %v484_v54 }
  0xd2   :  { %v793_v0 = vpop.eup %792  ;;  %v345_v3 = vmul.f32 %v791_v56, %v341_v60  ;;  %804 = vpow2.f32 %v548_v52  ;;  %v584_v19 = vmul.f32 1.442695, %v577_v6  ;;  %v557_v28 = vperm.slane %v1024_v43, 6 }
  0xd3   :  { %v795_v7 = vpop.eup %794  ;;  %v373_v11 = vadd.f32 %v793_v0, %v791_v56  ;;  %v381_v22 = vmul.f32 %v793_v0, %v377_v10  ;;  %v516_v16 = vadd.f32 %v789_v31, %v480_v58  ;;  %806 = vpow2.f32 %v582_v40 }
  0xd4   :  { %v797_v12 = vpop.eup %796  ;;  %v417_v57 = vmul.f32 %v795_v7, %v413_v23  ;;  %v492_v10 = vadd.f32 %v488_v13, %v456_v5  ;;  %v524_v9 = vmul.f32 %v789_v31, %v520_v1  ;;  %v592_v29 = vperm.slane %v989_v4, 7 }
  0xd5   :  { %v799_v60 = vpop.eup %798  ;;  %v385_v26 = vadd.f32 %v381_v22, %v345_v3  ;;  %v409_v27 = vadd.f32 %v795_v7, %v373_v11  ;;  %v593_v54 = vperm.slane %v1024_v43, 7  ;;  %v453_v38 = vmul.f32 %v797_v12, %v449_v48 }
  0xd6   :  { %v801_v59 = vpop.eup %800  ;;  %v277_v39 = vsel %vm241_vm1, %v975_v46, inf  ;;  %808 = vpow2.f32 %v584_v19  ;;  %v276_v23 = vmin.f32 %v987_v2, %v275_v21  ;;  %v489_v4 = vmul.f32 %v799_v60, %v485_v62 }
  0xd7   :  { %v803_v34 = vpop.eup %802  ;;  %v421_v35 = vadd.f32 %v417_v57, %v385_v26  ;;  %v445_v36 = vadd.f32 %v797_v12, %v409_v27  ;;  %v278_v44 = vrot.slane %v277_v39, 4  ;;  %v254_v43 = vrot.slane %v1006_v20, 1 }
  0xd8   :  { %v552_v42 = vadd.f32 %v803_v34, %v516_v16  ;;  %v805_v41 = vpop.eup %804  ;;  %v525_v47 = vmul.f32 %v801_v59, %v521_v32  ;;  %v528_v30 = vadd.f32 %v524_v9, %v492_v10  ;;  %v302_v48 = vmul.f32 %v1004_v17, %v983_v63 }
  0xd9   :  { %v457_v1 = vadd.f32 %v453_v38, %v421_v35  ;;  %v481_v45 = vadd.f32 %v799_v60, %v445_v36  ;;  %v807_v24 = vpop.eup %806  ;;  %v279_v33 = vmin.f32 %v277_v39, %v278_v44  ;;  %v560_v2 = vmul.f32 %v803_v34, %v556_v18 }
  0xda   :  { %v588_v50 = vadd.f32 %v807_v24, %v552_v42  ;;  %v306_v51 = vmul.f32 %v276_v23, %v983_v63  ;;  %v314_v52 = vperm.slane %v971_v37, 0  ;;  %v561_v53 = vmul.f32 %v805_v41, %v557_v28 }
  0xdb   :  { %v493_v25 = vadd.f32 %v489_v4, %v457_v1  ;;  %v517_v49 = vadd.f32 %v801_v59, %v481_v45  ;;  %v280_v21 = vrot.slane %v279_v33, 2  ;;  %v255_v55 = vmax.f32 %v1006_v20, %v254_v43 }
  0xdc   :  { %v809_v56 = vpop.eup %808  ;;  %v564_v58 = vadd.f32 %v560_v2, %v528_v30  ;;  %810 = vrcp.f32 %v588_v50  ;;  %v1124_v62 = vsel %vm298_vm4, %v302_v48, %v306_v51  ;;  %v315_v0 = vperm.slane %v975_v46, 0 }
  0xdd   :  { %v529_v31 = vadd.f32 %v525_v47, %v493_v25  ;;  %v553_v61 = vadd.f32 %v805_v41, %v517_v49  ;;  %v281_v17 = vmin.f32 %v279_v33, %v280_v21  ;;  %v318_v3 = vmul.f32 %v314_v52, %v983_v63 }
  0xde   :  { %v596_v6 = vmul.f32 %v807_v24, %v592_v29  ;;  %v350_v7 = vperm.slane %v971_v37, 1  ;;  %v303_v20 = vmul.f32 %v255_v55, %v999_v14  ;;  %v351_v22 = vperm.slane %v975_v46, 1 }
  0xdf   :  { %v589_v32 = vadd.f32 %v809_v56, %v553_v61  ;;  %v565_v5 = vadd.f32 %v561_v53, %v529_v31  ;;  %v282_v40 = vrot.slane %v281_v17, 1  ;;  %v322_v11 = vsub.f32 %v318_v3, %v1124_v62 }
  0xe0   :  { %v597_v18 = vmul.f32 %v809_v56, %v593_v54  ;;  %v600_v12 = vadd.f32 %v596_v6, %v564_v58  ;;  %v354_v16 = vmul.f32 %v350_v7, %v983_v63  ;;  %v319_v19 = vmul.f32 %v315_v0, %v999_v14 }
  0xe1   :  { %812 = vrcp.f32 %v589_v32  ;;  %v283_v13 = vmin.f32 %v281_v17, %v282_v40  ;;  %v326_v60 = vmul.f32 1.442695, %v322_v11  ;;  %v386_v26 = vperm.slane %v971_v37, 2 }
  0xe2   :  { %v387_v27 = vperm.slane %v975_v46, 2  ;;  %v811_v57 = vpop.eup %810  ;;  %v601_v28 = vadd.f32 %v597_v18, %v565_v5  ;;  %v355_v10 = vmul.f32 %v351_v22, %v999_v14  ;;  %v358_v9 = vsub.f32 %v354_v16, %v1124_v62 }
  0xe3   :  { %v307_v59 = vmul.f32 %v283_v13, %v999_v14  ;;  %v608_v29 = vmul.f32 %v811_v57, %v600_v12  ;;  %814 = vpow2.f32 %v326_v60  ;;  %v390_v54 = vmul.f32 %v386_v26, %v983_v63 }
  0xe4   :  { %v391_v34 = vmul.f32 %v387_v27, %v999_v14  ;;  %v362_v36 = vmul.f32 1.442695, %v358_v9  ;;  %v422_v38 = vperm.slane %v971_v37, 3  ;;  %v423_v39 = vperm.slane %v975_v46, 3 }
  0xe5   :  { %v1144_v35 = vsel %vm299_vm5, %v303_v20, %v307_v59  ;;  %v394_v41 = vsub.f32 %v390_v54, %v1124_v62  ;;  %v338_v48 = vperm.slane %v996_v8, 0  ;;  %v339_v2 = vperm.slane %v1001_v15, 0 }
  0xe6   :  { %v323_v23 = vsub.f32 %v319_v19, %v1144_v35  ;;  %v359_v44 = vsub.f32 %v355_v10, %v1144_v35  ;;  %v395_v1 = vsub.f32 %v391_v34, %v1144_v35  ;;  %816 = vpow2.f32 %v362_v36 }
  0xe7   :  { %v813_v42 = vpop.eup %812  ;;  %v426_v4 = vmul.f32 %v422_v38, %v983_v63  ;;  %v427_v43 = vmul.f32 %v423_v39, %v999_v14  ;;  %v398_v30 = vmul.f32 1.442695, %v394_v41  ;;  %v374_v21 = vperm.slane %v996_v8, 1 }
  0xe8   :  { %v609_v45 = vmul.f32 %v813_v42, %v601_v28  ;;  %v328_v24 = vmul.f32 1.442695, %v323_v23  ;;  %v364_v47 = vmul.f32 1.442695, %v359_v44  ;;  %v458_v51 = vperm.slane %v971_v37, 4 }
  0xe9   :  { %v430_v25 = vsub.f32 %v426_v4, %v1124_v62  ;;  %v431_v49 = vsub.f32 %v427_v43, %v1144_v35  ;;  %v815_v50 = vpop.eup %814  ;;  %v400_v31 = vmul.f32 1.442695, %v395_v1  ;;  %v459_v55 = vperm.slane %v975_v46, 4 }
  0xea   :  { %v611_v33 = vpack.c.bf16 %v609_v45, %v608_v29  ;;  %818 = vpow2.f32 %v328_v24  ;;  %v342_v52 = vmul.f32 %v815_v50, %v338_v48  ;;  %v462_v56 = vmul.f32 %v458_v51, %v983_v63 }
  0xeb   :  { %820 = vpow2.f32 %v364_v47  ;;  %v434_v61 = vmul.f32 1.442695, %v430_v25  ;;  %v436_v53 = vmul.f32 1.442695, %v431_v49  ;;  %v375_v17 = vperm.slane %v1001_v15, 1 }
  0xec   :  { %663 = vmatpush.bf16.msra.mxu1 %v611_v33  ;;  %822 = vpow2.f32 %v398_v30  ;;  %v817_v58 = vpop.eup %816  ;;  %v410_v32 = vperm.slane %v996_v8, 2  ;;  %v494_v0 = vperm.slane %v971_v37, 5  ;;  %v495_v3 = vperm.slane %v975_v46, 5 }
  0xed   :  { %v370_v5 = vadd.f32 %v817_v58, %v815_v50  ;;  %v378_v6 = vmul.f32 %v817_v58, %v374_v21  ;;  %824 = vpow2.f32 %v434_v61  ;;  %v463_v40 = vmul.f32 %v459_v55, %v999_v14 }
  0xee   :  { %826 = vpow2.f32 %v400_v31  ;;  %v466_v7 = vsub.f32 %v462_v56, %v1124_v62  ;;  %v498_v20 = vmul.f32 %v494_v0, %v983_v63  ;;  %v499_v11 = vmul.f32 %v495_v3, %v999_v14 }
  0xef   :  { %v382_v18 = vadd.f32 %v378_v6, %v342_v52  ;;  %828 = vpow2.f32 %v436_v53  ;;  %v446_v12 = vperm.slane %v996_v8, 3  ;;  %v467_v13 = vsub.f32 %v463_v40, %v1144_v35 }
  0xf0   :  { %v819_v22 = vpop.eup %818  ;;  %v470_v60 = vmul.f32 1.442695, %v466_v7  ;;  %v502_v26 = vsub.f32 %v498_v20, %v1124_v62  ;;  %v503_v27 = vsub.f32 %v499_v11, %v1144_v35  ;;  %v530_v9 = vperm.slane %v971_v37, 6 }
  0xf1   :  { %v821_v16 = vpop.eup %820  ;;  %v343_v19 = vmul.f32 %v819_v22, %v339_v2  ;;  %v472_v10 = vmul.f32 1.442695, %v467_v13  ;;  %v411_v45 = vperm.slane %v1001_v15, 2  ;;  %v531_v24 = vperm.slane %v975_v46, 6 }
  0xf2   :  { %v823_v57 = vpop.eup %822  ;;  %v371_v28 = vadd.f32 %v821_v16, %v819_v22  ;;  %v379_v59 = vmul.f32 %v821_v16, %v375_v17  ;;  %830 = vpow2.f32 %v470_v60  ;;  %v506_v34 = vmul.f32 1.442695, %v502_v26 }
  0xf3   :  { %v406_v29 = vadd.f32 %v823_v57, %v370_v5  ;;  %v414_v54 = vmul.f32 %v823_v57, %v410_v32  ;;  %v825_v36 = vpop.eup %824  ;;  %v508_v43 = vmul.f32 1.442695, %v503_v27  ;;  %v534_v47 = vmul.f32 %v530_v9, %v983_v63 }
  0xf4   :  { %v827_v38 = vpop.eup %826  ;;  %v450_v23 = vmul.f32 %v825_v36, %v446_v12  ;;  %832 = vpow2.f32 %v506_v34  ;;  %v383_v41 = vadd.f32 %v379_v59, %v343_v19  ;;  %v447_v30 = vperm.slane %v1001_v15, 3 }
  0xf5   :  { %v418_v39 = vadd.f32 %v414_v54, %v382_v18  ;;  %v442_v42 = vadd.f32 %v825_v36, %v406_v29  ;;  %v829_v44 = vpop.eup %828  ;;  %v407_v1 = vadd.f32 %v827_v38, %v371_v28  ;;  %834 = vpow2.f32 %v472_v10 }
  0xf6   :  { %v482_v33 = vperm.slane %v996_v8, 4  ;;  %v518_v48 = vperm.slane %v996_v8, 5  ;;  %v566_v25 = vperm.slane %v971_v37, 7  ;;  %v415_v50 = vmul.f32 %v827_v38, %v411_v45 }
  0xf7   :  { %v454_v4 = vadd.f32 %v450_v23, %v418_v39  ;;  %v535_v2 = vmul.f32 %v531_v24, %v999_v14  ;;  %v538_v21 = vsub.f32 %v534_v47, %v1124_v62  ;;  %v567_v51 = vperm.slane %v975_v46, 7 }
  0xf8   :  { %v831_v49 = vpop.eup %830  ;;  %v443_v52 = vadd.f32 %v829_v44, %v407_v1  ;;  %v570_v53 = vmul.f32 %v566_v25, %v983_v63  ;;  %v419_v56 = vadd.f32 %v415_v50, %v383_v41  ;;  %836 = vpow2.f32 %v508_v43  ;;  %v628_v50 = vpop.permute.xlu1 %627 }
  0xf9   :  { %v478_v31 = vadd.f32 %v831_v49, %v442_v42  ;;  %v486_v61 = vmul.f32 %v831_v49, %v482_v33  ;;  %v539_v58 = vsub.f32 %v535_v2, %v1144_v35  ;;  %v542_v17 = vmul.f32 1.442695, %v538_v21  ;;  %v760_v33 = vld [vmem:[%s1222_s3] sm:$0xff] }
  0xfa   :  { %v833_v55 = vpop.eup %832  ;;  %v571_v5 = vmul.f32 %v567_v51, %v999_v14  ;;  %v574_v46 = vsub.f32 %v570_v53, %v1124_v62  ;;  %v451_v40 = vmul.f32 %v829_v44, %v447_v30  ;;  %v483_v18 = vperm.slane %v1001_v15, 4  ;;  %v633_v51 = vpop.permute.xlu2 %632 }
  0xfb   :  { %v835_v37 = vpop.eup %834  ;;  %v490_v32 = vadd.f32 %v486_v61, %v454_v4  ;;  %v514_v0 = vadd.f32 %v833_v55, %v478_v31  ;;  %v522_v3 = vmul.f32 %v833_v55, %v518_v48  ;;  %838 = vpow2.f32 %v542_v17  ;;  %v761_v48 = vld [vmem:[%s1222_s3 + $0x8] sm:$0xff] }
  0xfc   :  { %v544_v6 = vmul.f32 1.442695, %v539_v58  ;;  %v479_v7 = vadd.f32 %v835_v37, %v443_v52  ;;  %v575_v63 = vsub.f32 %v571_v5, %v1144_v35  ;;  %v578_v11 = vmul.f32 1.442695, %v574_v46 }
  0xfd   :  { %v526_v20 = vadd.f32 %v522_v3, %v490_v32  ;;  %v455_v22 = vadd.f32 %v451_v40, %v419_v56  ;;  %v487_v16 = vmul.f32 %v835_v37, %v483_v18  ;;  %v554_v14 = vperm.slane %v996_v8, 6 }
  0xfe   :  { %840 = vpow2.f32 %v544_v6  ;;  %v580_v12 = vmul.f32 1.442695, %v575_v63  ;;  %v837_v13 = vpop.eup %836  ;;  %v519_v26 = vperm.slane %v1001_v15, 5  ;;  %v590_v9 = vperm.slane %v996_v8, 7 }
  0xff   :  { %842 = vpow2.f32 %v578_v11  ;;  %v515_v19 = vadd.f32 %v837_v13, %v479_v7  ;;  %v491_v62 = vadd.f32 %v487_v16, %v455_v22  ;;  %v555_v36 = vperm.slane %v1001_v15, 6 }
 0x100   :  { %844 = vpow2.f32 %v580_v12  ;;  %v523_v28 = vmul.f32 %v837_v13, %v519_v26  ;;  %v591_v1 = vperm.slane %v1001_v15, 7  ;;  %v623_v15 = vpop.permute.xlu0 %622 }
 0x101   :  { %v839_v60 = vpop.eup %838 }
 0x102   :  { %v550_v27 = vadd.f32 %v839_v60, %v514_v0  ;;  %v558_v57 = vmul.f32 %v839_v60, %v554_v14  ;;  %v527_v34 = vadd.f32 %v523_v28, %v491_v62 }
 0x104   :  { %v841_v35 = vpop.eup %840  ;;  %v562_v10 = vadd.f32 %v558_v57, %v526_v20 }
 0x105   :  { %v551_v59 = vadd.f32 %v841_v35, %v515_v19  ;;  %v843_v29 = vpop.eup %842  ;;  %v559_v23 = vmul.f32 %v841_v35, %v555_v36 }
 0x106   :  { %v845_v54 = vpop.eup %844  ;;  %v586_v38 = vadd.f32 %v843_v29, %v550_v27  ;;  %v594_v39 = vmul.f32 %v843_v29, %v590_v9 }
 0x107   :  { %v587_v42 = vadd.f32 %v845_v54, %v551_v59  ;;  %v563_v41 = vadd.f32 %v559_v23, %v527_v34  ;;  %v595_v45 = vmul.f32 %v845_v54, %v591_v1 }
 0x108   :  { %v598_v44 = vadd.f32 %v594_v39, %v562_v10  ;;  %846 = vrcp.f32 %v586_v38  ;;  %v638_v61 = vpop.permute.xlu0 %637 }
 0x109   :  { %848 = vrcp.f32 %v587_v42  ;;  %v599_v43 = vadd.f32 %v595_v45, %v563_v41 }
 0x10e   :  { %v847_v4 = vpop.eup %846 }
 0x10f   :  { %v849_v24 = vpop.eup %848  ;;  %v606_v8 = vmul.f32 %v847_v4, %v598_v44 }
 0x110   :  { %v607_v47 = vmul.f32 %v849_v24, %v599_v43 }
 0x112   :  { %v610_v30 = vpack.c.bf16 %v607_v47, %v606_v8 }
 0x114   :  { %664 = vmatpush.bf16.msra.mxu1 %v610_v30 }
 0x117   :  { %746 = vmatmul.msk.bf16.vlgmr.msra.gmra.mxu1 %vm650_vm6, %v760_v33 }
 0x127   :  { %747 = vmatmul.msk.bf16.gmra.mxu1 %vm650_vm6, %v761_v48 }
 0x194   :  { %v666_v25 = vpop.f32.mrf.mxu1 }
 0x195   :  { %v667_v49 = vadd.f32 %v666_v25, %v623_v15 }
 0x197   :  { %676 = vst.msk [vmem:[%s1223_s5] sm:$0xff] %vm241_vm1, %v667_v49 }
 0x19c   :  { %v668_v2 = vpop.f32.mrf.mxu1 }
 0x19d   :  { %v669_v21 = vadd.f32 %v668_v2, %v628_v50 }
 0x19f   :  { %677 = vst.msk [vmem:[%s1223_s5 + $0x8] sm:$0xff] %vm241_vm1, %v669_v21 }
 0x1a4   :  { %v671_v52 = vpop.f32.mrf.mxu1 }
 0x1a5   :  { %v672_v31 = vadd.f32 %v671_v52, %v633_v51 }
 0x1a7   :  { %678 = vst.msk [vmem:[%s1223_s5 + $0x10] sm:$0xff] %vm241_vm1, %v672_v31 }
 0x1ac   :  { %v673_v53 = vpop.f32.mrf.mxu1 }
 0x1ad   :  { %v674_v55 = vadd.f32 %v673_v53, %v638_v61 }
 0x1af   :  { %679 = vst.msk [vmem:[%s1223_s5 + $0x18] sm:$0xff] %vm241_vm1, %v674_v55 }

// kernel: forward.1
= control target key start
LH: loop header
LB: loop body
LE: loop exit
PB: predicated region body
PF: predicated region fallthrough
CT: control target
= control target key end

     0   :  { %10 = vsyncpa [#allocation3], 0  ;;  %s1312_s0 = inlined_call_operand.vmem [shape: bf16[96,2], index: 0, kind: input, shape index: {}]   ;;  %s1313_s1 = inlined_call_operand.vmem [shape: bf16[96,96], index: 1, kind: input, shape index: {}]   ;;  %s1314_s2 = inlined_call_operand.hbm [shape: f32[96,1], index: 2, kind: input, shape index: {}]   ;;  %s1315_s3 = inlined_call_operand.hbm [shape: bf16[32,32], index: 3, kind: input, shape index: {}]   ;;  %s1316_s4 = inlined_call_operand.hbm [shape: f32[32,1], index: 4, kind: input, shape index: {}]   ;;  %s1317_s5 = inlined_call_operand.vmem [shape: f32[32,2], index: 5, kind: output, shape index: {}]  }
   0x1   :  { %11 = vsyncpa [#allocation5], 0  ;;  %s33_s20 = sshll.u32 %s1315_s3, 4  ;;  %s982_s21 = smov [#allocation4]   ;;  %s34_s20 = int_to_ptr.hbm [resolvable:$true] %s33_s20 }
   0x2   :  { %s35_s22 = sshll.u32 %s982_s21, 4  ;;  %s20_s25 = sshll.u32 %s1314_s2, 4  ;;  %s36_s22 = int_to_ptr.vmem [resolvable:$true] %s35_s22  ;;  %s21_s25 = int_to_ptr.hbm [resolvable:$true] %s20_s25 }
   0x3   :  { %s983_s26 = smov 64   ;;  %s984_s27 = smov 4  }
   0x4   :  { %41 = dma.hbm_to_vmem [thread:$0]  %s34_s20, 256, %s36_s22, [#allocation5], %s983_s26, %s983_s26, %s984_s27  }
   0x5   :  { %s985_s28 = smov [#allocation2]   ;;  %s986_s30 = smov 128  }
   0x6   :  { %s22_s29 = sshll.u32 %s985_s28, 4  ;;  %s987_s6 = smov 8   ;;  %s23_s29 = int_to_ptr.vmem [resolvable:$true] %s22_s29 }
   0x7   :  { %28 = dma.hbm_to_vmem [thread:$0]  %s21_s25, 1536, %s23_s29, [#allocation3], %s986_s30, %s986_s30, %s987_s6  }
   0x8   :  { %s46_s8 = sshll.u32 %s1316_s4, 4  ;;  %s988_s9 = smov [#allocation6]   ;;  %s47_s8 = int_to_ptr.hbm [resolvable:$true] %s46_s8 }
   0x9   :  { %s48_s10 = sshll.u32 %s988_s9, 4  ;;  %s49_s10 = int_to_ptr.vmem [resolvable:$true] %s48_s10 }
   0xa   :  { %54 = dma.hbm_to_vmem [thread:$0]  %s47_s8, 512, %s49_s10, [#allocation5], %s986_s30, %s986_s30, %s987_s6  }
   0xb   :  { %978 = dma.done.wait [#allocation3], 1536  }
   0xc   :  { %979 = vsyncadd [#allocation3], 4294965760 }
   0xd   :  { %980 = dma.done.wait [#allocation5], 768  }
   0xe   :  { %981 = vsyncadd [#allocation5], 4294966528  ;;  %v989_v0 = vmov 0   ;;  %v808_v1 = vld [vmem:[%s1312_s0 + $0x28] sm:$0xff]  ;;  %v98_v2 = vld [vmem:[#allocation2 + $0x30] sm:$0xff]  ;;  %vm230_vm0 = vcmask 785408  }
   0xf   :  { %831 = vset.pattern.permute.xlu0 %v989_v0  ;;  %832 = vset.pattern.permute.xlu1 %v989_v0  ;;  %v807_v3 = vld [vmem:[%s1312_s0 + $0x20] sm:$0xff]  ;;  %v806_v5 = vld [vmem:[%s1312_s0 + $0x18] sm:$0xff]  ;;  %v97_v7 = vld [vmem:[#allocation2 + $0x28] sm:$0xff]  ;;  %vm288_vm1 = vcmask 15360   ;;  %vm697_vm6 = vcmask 261120  }
  0x10   :  { %833 = vset.pattern.permute.xlu2 %v989_v0  ;;  %811 = vmatpush.bf16.msra.mxu2 %v808_v1  ;;  %v96_v4 = vld [vmem:[#allocation2 + $0x20] sm:$0xff]  ;;  %v99_v6 = vld [vmem:[#allocation2 + $0x38] sm:$0xff]  ;;  %v805_v8 = vld [vmem:[%s1312_s0 + $0x10] sm:$0xff] }
  0x11   :  { %812 = vmatpush.bf16.msra.mxu3 %v808_v1  ;;  %251 = vmatpush.bf16.msra.mxu0 %v808_v1  ;;  %v94_v9 = vld [vmem:[#allocation2 + $0x10] sm:$0xff]  ;;  %v804_v10 = vld [vmem:[%s1312_s0 + $0x8] sm:$0xff]  ;;  %v92_v11 = vld [vmem:[#allocation2] sm:$0xff] }
  0x12   :  { %136 = vperm.xlu0 %831, %v98_v2   ;;  %126 = vperm.xlu1 %832, %v96_v4   ;;  %v93_v12 = vld [vmem:[#allocation2 + $0x8] sm:$0xff]  ;;  %v95_v13 = vld [vmem:[#allocation2 + $0x18] sm:$0xff]  ;;  %v803_v14 = vld [vmem:[%s1312_s0] sm:$0xff] }
  0x13   :  { %116 = vperm.xlu2 %833, %v94_v9   ;;  %v799_v15 = vld [vmem:[%s1313_s1 + $0x10] sm:$0xff]  ;;  %v801_v16 = vld [vmem:[%s1313_s1 + $0x20] sm:$0xff]  ;;  %v103_v18 = vld [vmem:[#allocation2 + $0x58] sm:$0xff] }
  0x14   :  { %813 = vmatpush.bf16.msra.mxu2 %v807_v3  ;;  %v797_v17 = vld [vmem:[%s1313_s1] sm:$0xff]  ;;  %v102_v20 = vld [vmem:[#allocation2 + $0x50] sm:$0xff]  ;;  %v664_v22 = vld [vmem:[#allocation6 + $0x8] sm:$0xff] }
  0x15   :  { %814 = vmatpush.bf16.msra.mxu3 %v807_v3  ;;  %252 = vmatpush.bf16.msra.mxu0 %v807_v3  ;;  %v100_v19 = vld [vmem:[#allocation2 + $0x40] sm:$0xff]  ;;  %v663_v21 = vld [vmem:[#allocation6] sm:$0xff]  ;;  %v101_v23 = vld [vmem:[#allocation2 + $0x48] sm:$0xff] }
  0x16   :  { %v800_v24 = vld [vmem:[%s1313_s1 + $0x18] sm:$0xff]  ;;  %v802_v25 = vld [vmem:[%s1313_s1 + $0x28] sm:$0xff]  ;;  %v665_v28 = vld [vmem:[#allocation6 + $0x10] sm:$0xff] }
  0x17   :  { %v798_v26 = vld [vmem:[%s1313_s1 + $0x8] sm:$0xff] }
  0x18   :  { %815 = vmatpush.bf16.msra.mxu2 %v806_v5  ;;  %v666_v27 = vld [vmem:[#allocation6 + $0x18] sm:$0xff] }
  0x19   :  { %816 = vmatpush.bf16.msra.mxu3 %v806_v5  ;;  %253 = vmatpush.bf16.msra.mxu0 %v806_v5 }
  0x1a   :  { %141 = vperm.xlu0 %831, %v99_v6   ;;  %131 = vperm.xlu1 %832, %v97_v7  }
  0x1b   :  { %121 = vperm.xlu2 %833, %v95_v13  }
  0x1c   :  { %817 = vmatpush.bf16.msra.mxu2 %v805_v8 }
  0x1d   :  { %818 = vmatpush.bf16.msra.mxu3 %v805_v8  ;;  %254 = vmatpush.bf16.msra.mxu0 %v805_v8 }
  0x20   :  { %819 = vmatpush.bf16.msra.mxu2 %v804_v10 }
  0x21   :  { %820 = vmatpush.bf16.msra.mxu3 %v804_v10  ;;  %255 = vmatpush.bf16.msra.mxu0 %v804_v10 }
  0x22   :  { %106 = vperm.xlu0 %831, %v92_v11   ;;  %111 = vperm.xlu1 %832, %v93_v12  }
  0x23   :  { %156 = vperm.xlu2 %833, %v102_v20  }
  0x24   :  { %821 = vmatpush.bf16.msra.mxu2 %v803_v14 }
  0x25   :  { %822 = vmatpush.bf16.msra.mxu3 %v803_v14  ;;  %256 = vmatpush.bf16.msra.mxu0 %v803_v14 }
  0x27   :  { %783 = vmatmul.msk.bf16.vlgmr.msra.gmra.mxu2 %vm230_vm0, %v799_v15 }
  0x28   :  { %785 = vmatmul.msk.bf16.vlgmr.msra.gmra.mxu3 %vm230_vm0, %v801_v16  ;;  %781 = vmatmul.msk.bf16.vlgmr.msra.gmra.mxu0 %vm230_vm0, %v797_v17 }
  0x2a   :  { %161 = vperm.xlu0 %831, %v103_v18   ;;  %146 = vperm.xlu1 %832, %v100_v19  }
  0x2b   :  { %151 = vperm.xlu2 %833, %v101_v23  }
  0x32   :  { %669 = vperm.xlu0 %831, %v663_v21   ;;  %674 = vperm.xlu1 %832, %v664_v22  }
  0x33   :  { %679 = vperm.xlu2 %833, %v665_v28  }
  0x37   :  { %784 = vmatmul.msk.bf16.gmra.mxu2 %vm230_vm0, %v800_v24 }
  0x38   :  { %786 = vmatmul.msk.bf16.gmra.mxu3 %vm230_vm0, %v802_v25  ;;  %782 = vmatmul.msk.bf16.gmra.mxu0 %vm230_vm0, %v798_v26 }
  0x3a   :  { %684 = vperm.xlu0 %831, %v666_v27  }
  0x6d   :  { %v117_v30 = vpop.permute.xlu2 %116 }
  0x75   :  { %v122_v34 = vpop.permute.xlu2 %121 }
  0x7d   :  { %v157_v49 = vpop.permute.xlu2 %156 }
  0x84   :  { %v127_v29 = vpop.permute.xlu1 %126  ;;  %v137_v31 = vpop.permute.xlu0 %136 }
  0x85   :  { %v152_v9 = vpop.permute.xlu2 %151 }
  0x8c   :  { %v132_v33 = vpop.permute.xlu1 %131  ;;  %v142_v41 = vpop.permute.xlu0 %141 }
  0x94   :  { %v112_v45 = vpop.permute.xlu1 %111  ;;  %v107_v58 = vpop.permute.xlu0 %106 }
  0x9c   :  { %v147_v3 = vpop.permute.xlu1 %146 }
  0xa5   :  { %v258_v32 = vpop.f32.mrf.mxu0 }
  0xa6   :  { %v1083_v63 = vadd.f32 %v258_v32, %v107_v58 }
  0xa8   :  { %vm345_vm4 = vcmp.ge.f32.partialorder %v1083_v63, 0.0 }
  0xaa   :  { %v268_v35 = vpop.f32.mrf.mxu2 }
  0xab   :  { %v278_v36 = vpop.f32.mrf.mxu3  ;;  %v1071_v37 = vadd.f32 %v268_v35, %v127_v29 }
  0xac   :  { %v1096_v8 = vadd.f32 %v278_v36, %v147_v3  ;;  %v162_v36 = vpop.permute.xlu0 %161 }
  0xad   :  { %v260_v38 = vpop.f32.mrf.mxu0  ;;  %v289_v39 = vsel %vm288_vm1, %v1071_v37, -inf  ;;  %v317_v48 = vsel %vm288_vm1, %v1071_v37, inf }
  0xae   :  { %v290_v40 = vrot.slane %v289_v39, 4  ;;  %v318_v50 = vrot.slane %v317_v48, 4  ;;  %v1099_v14 = vadd.f32 %v260_v38, %v112_v45 }
  0xb0   :  { %v291_v42 = vmax.f32 %v289_v39, %v290_v40  ;;  %v319_v54 = vmin.f32 %v317_v48, %v318_v50  ;;  %vm346_vm5 = vcmp.ge.f32.partialorder %v1099_v14, 0.0 }
  0xb2   :  { %v270_v43 = vpop.f32.mrf.mxu2  ;;  %v292_v47 = vrot.slane %v291_v42, 2  ;;  %v320_v57 = vrot.slane %v319_v54, 2 }
  0xb3   :  { %v280_v44 = vpop.f32.mrf.mxu3  ;;  %v1075_v46 = vadd.f32 %v270_v43, %v132_v33 }
  0xb4   :  { %v293_v55 = vmax.f32 %v291_v42, %v292_v47  ;;  %v1087_v2 = vmin.f32 %v319_v54, %v320_v57  ;;  %v1101_v15 = vadd.f32 %v280_v44, %v152_v9 }
  0xb5   :  { %v263_v51 = vpop.f32.mrf.mxu0  ;;  %v296_v52 = vsel %vm288_vm1, %v1075_v46, -inf }
  0xb6   :  { %v297_v53 = vrot.slane %v296_v52, 4  ;;  %v294_v62 = vrot.slane %v293_v55, 1  ;;  %v1085_v0 = vadd.f32 %v263_v51, %v117_v30  ;;  %v322_v21 = vrot.slane %v1087_v2, 1 }
  0xb8   :  { %v298_v56 = vmax.f32 %v296_v52, %v297_v53  ;;  %v1104_v17 = vmax.f32 %v293_v55, %v294_v62  ;;  %vm347_vm2 = vcmp.ge.f32.partialorder %v1085_v0, 0.0 }
  0xba   :  { %v273_v59 = vpop.f32.mrf.mxu2  ;;  %v299_v1 = vrot.slane %v298_v56, 2 }
  0xbb   :  { %v283_v60 = vpop.f32.mrf.mxu3  ;;  %v1081_v61 = vadd.f32 %v273_v59, %v137_v31 }
  0xbc   :  { %v1089_v4 = vadd.f32 %v283_v60, %v157_v49  ;;  %v1106_v20 = vmax.f32 %v298_v56, %v299_v1 }
  0xbd   :  { %v303_v5 = vsel %vm288_vm1, %v1081_v61, -inf  ;;  %v331_v6 = vsel %vm288_vm1, %v1081_v61, inf  ;;  %v363_v7 = vperm.slane %v1081_v61, 0  ;;  %v265_v10 = vpop.f32.mrf.mxu0  ;;  %v399_v13 = vperm.slane %v1081_v61, 1 }
  0xbe   :  { %v304_v11 = vrot.slane %v303_v5, 4  ;;  %v332_v12 = vrot.slane %v331_v6, 4  ;;  %v435_v16 = vperm.slane %v1081_v61, 2  ;;  %v1109_v22 = vadd.f32 %v265_v10, %v122_v34 }
  0xbf   :  { %v367_v23 = vmul.f32 %v363_v7, %v1085_v0  ;;  %v387_v24 = vperm.slane %v1089_v4, 0  ;;  %v423_v25 = vperm.slane %v1089_v4, 1  ;;  %v403_v30 = vmul.f32 %v399_v13, %v1085_v0 }
  0xc0   :  { %v305_v18 = vmax.f32 %v303_v5, %v304_v11  ;;  %v333_v19 = vmin.f32 %v331_v6, %v332_v12  ;;  %v459_v31 = vperm.slane %v1089_v4, 2  ;;  %v439_v33 = vmul.f32 %v435_v16, %v1085_v0 }
  0xc1   :  { %v471_v34 = vperm.slane %v1081_v61, 3  ;;  %v507_v35 = vperm.slane %v1081_v61, 4  ;;  %v495_v40 = vperm.slane %v1089_v4, 3  ;;  %v543_v42 = vperm.slane %v1081_v61, 5 }
  0xc2   :  { %v275_v26 = vpop.f32.mrf.mxu2  ;;  %v306_v28 = vrot.slane %v305_v18, 2  ;;  %v334_v29 = vrot.slane %v333_v19, 2  ;;  %v531_v54 = vperm.slane %v1089_v4, 4  ;;  %v567_v1 = vperm.slane %v1089_v4, 5 }
  0xc3   :  { %v285_v27 = vpop.f32.mrf.mxu3  ;;  %v1117_v32 = vadd.f32 %v275_v26, %v142_v41  ;;  %v475_v52 = vmul.f32 %v471_v34, %v1085_v0  ;;  %v511_v53 = vmul.f32 %v507_v35, %v1085_v0  ;;  %v547_v62 = vmul.f32 %v543_v42, %v1085_v0 }
  0xc4   :  { %v307_v38 = vmax.f32 %v305_v18, %v306_v28  ;;  %v335_v39 = vmin.f32 %v333_v19, %v334_v29  ;;  %v1124_v43 = vadd.f32 %v285_v27, %v162_v36  ;;  %vm348_vm3 = vcmp.ge.f32.partialorder %v1109_v22, 0.0 }
  0xc5   :  { %v310_v44 = vsel %vm288_vm1, %v1117_v32, -inf  ;;  %v338_v41 = vsel %vm288_vm1, %v1117_v32, inf  ;;  %v364_v45 = vperm.slane %v1117_v32, 0  ;;  %v400_v51 = vperm.slane %v1117_v32, 1 }
  0xc6   :  { %v308_v47 = vrot.slane %v307_v38, 1  ;;  %v311_v48 = vrot.slane %v310_v44, 4  ;;  %v336_v49 = vrot.slane %v335_v39, 1  ;;  %v339_v50 = vrot.slane %v338_v41, 4 }
  0xc7   :  { %v368_v59 = vmul.f32 %v364_v45, %v1109_v22  ;;  %v388_v60 = vperm.slane %v1124_v43, 0  ;;  %v404_v9 = vmul.f32 %v400_v51, %v1109_v22  ;;  %v424_v10 = vperm.slane %v1124_v43, 1 }
  0xc8   :  { %v309_v55 = vmax.f32 %v307_v38, %v308_v47  ;;  %v312_v56 = vmax.f32 %v310_v44, %v311_v48  ;;  %v337_v57 = vmin.f32 %v335_v39, %v336_v49  ;;  %v340_v58 = vmin.f32 %v338_v41, %v339_v50 }
  0xc9   :  { %v436_v11 = vperm.slane %v1117_v32, 2  ;;  %v472_v12 = vperm.slane %v1117_v32, 3  ;;  %v508_v19 = vperm.slane %v1117_v32, 4  ;;  %v544_v38 = vperm.slane %v1117_v32, 5 }
  0xca   :  { %v313_v3 = vrot.slane %v312_v56, 2  ;;  %v341_v5 = vrot.slane %v340_v58, 2  ;;  %v351_v6 = vmul.f32 %v309_v55, %v1085_v0  ;;  %v355_v7 = vmul.f32 %v337_v57, %v1085_v0 }
  0xcb   :  { %v440_v44 = vmul.f32 %v436_v11, %v1109_v22  ;;  %v579_v49 = vperm.slane %v1081_v61, 6  ;;  %v512_v55 = vmul.f32 %v508_v19, %v1109_v22 }
  0xcc   :  { %v314_v13 = vmax.f32 %v312_v56, %v313_v3  ;;  %v342_v16 = vmin.f32 %v340_v58, %v341_v5  ;;  %v1148_v18 = vsel %vm347_vm2, %v351_v6, %v355_v7  ;;  %v548_v56 = vmul.f32 %v544_v38, %v1109_v22 }
  0xcd   :  { %v371_v26 = vsub.f32 %v367_v23, %v1148_v18  ;;  %v407_v27 = vsub.f32 %v403_v30, %v1148_v18  ;;  %v443_v28 = vsub.f32 %v439_v33, %v1148_v18  ;;  %v479_v29 = vsub.f32 %v475_v52, %v1148_v18 }
  0xce   :  { %v315_v34 = vrot.slane %v314_v13, 1  ;;  %v343_v35 = vrot.slane %v342_v16, 1  ;;  %v515_v36 = vsub.f32 %v511_v53, %v1148_v18  ;;  %v460_v23 = vperm.slane %v1124_v43, 2 }
  0xcf   :  { %v377_v39 = vmul.f32 1.442695, %v371_v26  ;;  %v413_v42 = vmul.f32 1.442695, %v407_v27  ;;  %v449_v41 = vmul.f32 1.442695, %v443_v28  ;;  %v551_v48 = vsub.f32 %v547_v62, %v1148_v18 }
  0xd0   :  { %v316_v45 = vmax.f32 %v314_v13, %v315_v34  ;;  %v344_v47 = vmin.f32 %v342_v16, %v343_v35  ;;  %v485_v30 = vmul.f32 1.442695, %v479_v29  ;;  %v521_v33 = vmul.f32 1.442695, %v515_v36 }
  0xd1   :  { %834 = vpow2.f32 %v377_v39  ;;  %v580_v52 = vperm.slane %v1117_v32, 6  ;;  %v476_v53 = vmul.f32 %v472_v12, %v1109_v22  ;;  %v557_v58 = vmul.f32 1.442695, %v551_v48 }
  0xd2   :  { %v352_v50 = vmul.f32 %v316_v45, %v1109_v22  ;;  %v356_v51 = vmul.f32 %v344_v47, %v1109_v22  ;;  %836 = vpow2.f32 %v413_v42  ;;  %v583_v62 = vmul.f32 %v579_v49, %v1085_v0 }
  0xd3   :  { %838 = vpow2.f32 %v449_v41  ;;  %v584_v13 = vmul.f32 %v580_v52, %v1109_v22  ;;  %v615_v45 = vperm.slane %v1081_v61, 7  ;;  %v496_v48 = vperm.slane %v1124_v43, 3 }
  0xd4   :  { %v1169_v57 = vsel %vm348_vm3, %v352_v50, %v356_v51  ;;  %840 = vpow2.f32 %v485_v30  ;;  %v587_v28 = vsub.f32 %v583_v62, %v1148_v18  ;;  %v532_v62 = vperm.slane %v1124_v43, 4 }
  0xd5   :  { %v372_v3 = vsub.f32 %v368_v59, %v1169_v57  ;;  %v408_v5 = vsub.f32 %v404_v9, %v1169_v57  ;;  %v444_v6 = vsub.f32 %v440_v44, %v1169_v57  ;;  %v480_v7 = vsub.f32 %v476_v53, %v1169_v57 }
  0xd6   :  { %v516_v11 = vsub.f32 %v512_v55, %v1169_v57  ;;  %842 = vpow2.f32 %v521_v33  ;;  %v552_v12 = vsub.f32 %v548_v56, %v1169_v57  ;;  %v588_v39 = vsub.f32 %v584_v13, %v1169_v57 }
  0xd7   :  { %v835_v16 = vpop.eup %834  ;;  %v379_v19 = vmul.f32 1.442695, %v372_v3  ;;  %v415_v26 = vmul.f32 1.442695, %v408_v5  ;;  %v451_v27 = vmul.f32 1.442695, %v444_v6  ;;  %844 = vpow2.f32 %v557_v58 }
  0xd8   :  { %v837_v59 = vpop.eup %836  ;;  %v391_v9 = vmul.f32 %v835_v16, %v387_v24  ;;  %v487_v29 = vmul.f32 1.442695, %v480_v7  ;;  %v523_v34 = vmul.f32 1.442695, %v516_v11  ;;  %v559_v41 = vmul.f32 1.442695, %v552_v12 }
  0xd9   :  { %v839_v35 = vpop.eup %838  ;;  %846 = vpow2.f32 %v379_v19  ;;  %v419_v36 = vadd.f32 %v837_v59, %v835_v16  ;;  %v427_v38 = vmul.f32 %v837_v59, %v423_v25  ;;  %v593_v30 = vmul.f32 1.442695, %v587_v28 }
  0xda   :  { %v841_v42 = vpop.eup %840  ;;  %848 = vpow2.f32 %v415_v26  ;;  %v463_v44 = vmul.f32 %v839_v35, %v459_v31  ;;  %v616_v25 = vperm.slane %v1117_v32, 7  ;;  %v619_v49 = vmul.f32 %v615_v45, %v1085_v0 }
  0xdb   :  { %v431_v24 = vadd.f32 %v427_v38, %v391_v9  ;;  %850 = vpow2.f32 %v451_v27  ;;  %v455_v47 = vadd.f32 %v839_v35, %v419_v36  ;;  %v595_v52 = vmul.f32 1.442695, %v588_v39 }
  0xdc   :  { %v843_v33 = vpop.eup %842  ;;  %852 = vpow2.f32 %v487_v29  ;;  %v499_v61 = vmul.f32 %v841_v42, %v495_v40  ;;  %v620_v53 = vmul.f32 %v616_v25, %v1109_v22  ;;  %v623_v55 = vsub.f32 %v619_v49, %v1148_v18 }
  0xdd   :  { %v467_v50 = vadd.f32 %v463_v44, %v431_v24  ;;  %v491_v51 = vadd.f32 %v841_v42, %v455_v47  ;;  %854 = vpow2.f32 %v523_v34  ;;  %v845_v31 = vpop.eup %844  ;;  %v568_v32 = vperm.slane %v1124_v43, 5 }
  0xde   :  { %856 = vpow2.f32 %v559_v41  ;;  %v624_v6 = vsub.f32 %v620_v53, %v1169_v57  ;;  %v629_v40 = vmul.f32 1.442695, %v623_v55  ;;  %v603_v18 = vperm.slane %v1089_v4, 6 }
  0xdf   :  { %v847_v56 = vpop.eup %846  ;;  %v527_v58 = vadd.f32 %v843_v33, %v491_v51  ;;  %858 = vpow2.f32 %v593_v30  ;;  %v503_v5 = vadd.f32 %v499_v61, %v467_v50  ;;  %v535_v13 = vmul.f32 %v843_v33, %v531_v54 }
  0xe0   :  { %v849_v0 = vpop.eup %848  ;;  %v392_v3 = vmul.f32 %v847_v56, %v388_v60  ;;  %860 = vpow2.f32 %v595_v52  ;;  %v631_v19 = vmul.f32 1.442695, %v624_v6  ;;  %v604_v28 = vperm.slane %v1124_v43, 6 }
  0xe1   :  { %v851_v7 = vpop.eup %850  ;;  %v420_v11 = vadd.f32 %v849_v0, %v847_v56  ;;  %v428_v22 = vmul.f32 %v849_v0, %v424_v10  ;;  %v563_v16 = vadd.f32 %v845_v31, %v527_v58  ;;  %862 = vpow2.f32 %v629_v40 }
  0xe2   :  { %v853_v12 = vpop.eup %852  ;;  %v464_v57 = vmul.f32 %v851_v7, %v460_v23  ;;  %v539_v10 = vadd.f32 %v535_v13, %v503_v5  ;;  %v571_v9 = vmul.f32 %v845_v31, %v567_v1  ;;  %v639_v29 = vperm.slane %v1089_v4, 7 }
  0xe3   :  { %v855_v60 = vpop.eup %854  ;;  %v432_v26 = vadd.f32 %v428_v22, %v392_v3  ;;  %v456_v27 = vadd.f32 %v851_v7, %v420_v11  ;;  %v640_v54 = vperm.slane %v1124_v43, 7  ;;  %v500_v38 = vmul.f32 %v853_v12, %v496_v48 }
  0xe4   :  { %v857_v59 = vpop.eup %856  ;;  %v324_v39 = vsel %vm288_vm1, %v1075_v46, inf  ;;  %864 = vpow2.f32 %v631_v19  ;;  %v323_v23 = vmin.f32 %v1087_v2, %v322_v21  ;;  %v536_v4 = vmul.f32 %v855_v60, %v532_v62 }
  0xe5   :  { %v859_v34 = vpop.eup %858  ;;  %v468_v35 = vadd.f32 %v464_v57, %v432_v26  ;;  %v492_v36 = vadd.f32 %v853_v12, %v456_v27  ;;  %v325_v44 = vrot.slane %v324_v39, 4  ;;  %v301_v43 = vrot.slane %v1106_v20, 1 }
  0xe6   :  { %v599_v42 = vadd.f32 %v859_v34, %v563_v16  ;;  %v861_v41 = vpop.eup %860  ;;  %v572_v47 = vmul.f32 %v857_v59, %v568_v32  ;;  %v575_v30 = vadd.f32 %v571_v9, %v539_v10  ;;  %v349_v48 = vmul.f32 %v1104_v17, %v1083_v63 }
  0xe7   :  { %v504_v1 = vadd.f32 %v500_v38, %v468_v35  ;;  %v528_v45 = vadd.f32 %v855_v60, %v492_v36  ;;  %v863_v24 = vpop.eup %862  ;;  %v326_v33 = vmin.f32 %v324_v39, %v325_v44  ;;  %v607_v2 = vmul.f32 %v859_v34, %v603_v18 }
  0xe8   :  { %v635_v50 = vadd.f32 %v863_v24, %v599_v42  ;;  %v353_v51 = vmul.f32 %v323_v23, %v1083_v63  ;;  %v361_v52 = vperm.slane %v1071_v37, 0  ;;  %v608_v53 = vmul.f32 %v861_v41, %v604_v28 }
  0xe9   :  { %v540_v25 = vadd.f32 %v536_v4, %v504_v1  ;;  %v564_v49 = vadd.f32 %v857_v59, %v528_v45  ;;  %v327_v21 = vrot.slane %v326_v33, 2  ;;  %v302_v55 = vmax.f32 %v1106_v20, %v301_v43 }
  0xea   :  { %v865_v56 = vpop.eup %864  ;;  %v611_v58 = vadd.f32 %v607_v2, %v575_v30  ;;  %866 = vrcp.f32 %v635_v50  ;;  %v1224_v62 = vsel %vm345_vm4, %v349_v48, %v353_v51  ;;  %v362_v0 = vperm.slane %v1075_v46, 0 }
  0xeb   :  { %v576_v31 = vadd.f32 %v572_v47, %v540_v25  ;;  %v600_v61 = vadd.f32 %v861_v41, %v564_v49  ;;  %v328_v17 = vmin.f32 %v326_v33, %v327_v21  ;;  %v365_v3 = vmul.f32 %v361_v52, %v1083_v63 }
  0xec   :  { %v643_v6 = vmul.f32 %v863_v24, %v639_v29  ;;  %v397_v7 = vperm.slane %v1071_v37, 1  ;;  %v350_v20 = vmul.f32 %v302_v55, %v1099_v14  ;;  %v398_v22 = vperm.slane %v1075_v46, 1 }
  0xed   :  { %v636_v32 = vadd.f32 %v865_v56, %v600_v61  ;;  %v612_v5 = vadd.f32 %v608_v53, %v576_v31  ;;  %v329_v40 = vrot.slane %v328_v17, 1  ;;  %v369_v11 = vsub.f32 %v365_v3, %v1224_v62 }
  0xee   :  { %v644_v18 = vmul.f32 %v865_v56, %v640_v54  ;;  %v647_v12 = vadd.f32 %v643_v6, %v611_v58  ;;  %v401_v16 = vmul.f32 %v397_v7, %v1083_v63  ;;  %v366_v19 = vmul.f32 %v362_v0, %v1099_v14 }
  0xef   :  { %868 = vrcp.f32 %v636_v32  ;;  %v330_v13 = vmin.f32 %v328_v17, %v329_v40  ;;  %v373_v60 = vmul.f32 1.442695, %v369_v11  ;;  %v433_v26 = vperm.slane %v1071_v37, 2 }
  0xf0   :  { %v434_v27 = vperm.slane %v1075_v46, 2  ;;  %v867_v57 = vpop.eup %866  ;;  %v648_v28 = vadd.f32 %v644_v18, %v612_v5  ;;  %v402_v10 = vmul.f32 %v398_v22, %v1099_v14  ;;  %v405_v9 = vsub.f32 %v401_v16, %v1224_v62 }
  0xf1   :  { %v354_v59 = vmul.f32 %v330_v13, %v1099_v14  ;;  %v655_v29 = vmul.f32 %v867_v57, %v647_v12  ;;  %870 = vpow2.f32 %v373_v60  ;;  %v437_v54 = vmul.f32 %v433_v26, %v1083_v63 }
  0xf2   :  { %v438_v34 = vmul.f32 %v434_v27, %v1099_v14  ;;  %v409_v36 = vmul.f32 1.442695, %v405_v9  ;;  %v469_v38 = vperm.slane %v1071_v37, 3  ;;  %v470_v39 = vperm.slane %v1075_v46, 3 }
  0xf3   :  { %v1244_v35 = vsel %vm346_vm5, %v350_v20, %v354_v59  ;;  %v441_v41 = vsub.f32 %v437_v54, %v1224_v62  ;;  %v385_v48 = vperm.slane %v1096_v8, 0  ;;  %v386_v2 = vperm.slane %v1101_v15, 0 }
  0xf4   :  { %v370_v23 = vsub.f32 %v366_v19, %v1244_v35  ;;  %v406_v44 = vsub.f32 %v402_v10, %v1244_v35  ;;  %v442_v1 = vsub.f32 %v438_v34, %v1244_v35  ;;  %872 = vpow2.f32 %v409_v36 }
  0xf5   :  { %v869_v42 = vpop.eup %868  ;;  %v473_v4 = vmul.f32 %v469_v38, %v1083_v63  ;;  %v474_v43 = vmul.f32 %v470_v39, %v1099_v14  ;;  %v445_v30 = vmul.f32 1.442695, %v441_v41  ;;  %v421_v21 = vperm.slane %v1096_v8, 1 }
  0xf6   :  { %v656_v45 = vmul.f32 %v869_v42, %v648_v28  ;;  %v375_v24 = vmul.f32 1.442695, %v370_v23  ;;  %v411_v47 = vmul.f32 1.442695, %v406_v44  ;;  %v505_v51 = vperm.slane %v1071_v37, 4 }
  0xf7   :  { %v477_v25 = vsub.f32 %v473_v4, %v1224_v62  ;;  %v478_v49 = vsub.f32 %v474_v43, %v1244_v35  ;;  %v871_v50 = vpop.eup %870  ;;  %v447_v31 = vmul.f32 1.442695, %v442_v1  ;;  %v506_v55 = vperm.slane %v1075_v46, 4 }
  0xf8   :  { %v658_v33 = vpack.c.bf16 %v656_v45, %v655_v29  ;;  %874 = vpow2.f32 %v375_v24  ;;  %v389_v52 = vmul.f32 %v871_v50, %v385_v48  ;;  %v509_v56 = vmul.f32 %v505_v51, %v1083_v63 }
  0xf9   :  { %876 = vpow2.f32 %v411_v47  ;;  %v481_v61 = vmul.f32 1.442695, %v477_v25  ;;  %v483_v53 = vmul.f32 1.442695, %v478_v49  ;;  %v422_v17 = vperm.slane %v1101_v15, 1 }
  0xfa   :  { %710 = vmatpush.bf16.msra.mxu1 %v658_v33  ;;  %878 = vpow2.f32 %v445_v30  ;;  %v873_v58 = vpop.eup %872  ;;  %v457_v32 = vperm.slane %v1096_v8, 2  ;;  %v541_v0 = vperm.slane %v1071_v37, 5  ;;  %v542_v3 = vperm.slane %v1075_v46, 5 }
  0xfb   :  { %v417_v5 = vadd.f32 %v873_v58, %v871_v50  ;;  %v425_v6 = vmul.f32 %v873_v58, %v421_v21  ;;  %880 = vpow2.f32 %v481_v61  ;;  %v510_v40 = vmul.f32 %v506_v55, %v1099_v14 }
  0xfc   :  { %882 = vpow2.f32 %v447_v31  ;;  %v513_v7 = vsub.f32 %v509_v56, %v1224_v62  ;;  %v545_v20 = vmul.f32 %v541_v0, %v1083_v63  ;;  %v546_v11 = vmul.f32 %v542_v3, %v1099_v14 }
  0xfd   :  { %v429_v18 = vadd.f32 %v425_v6, %v389_v52  ;;  %884 = vpow2.f32 %v483_v53  ;;  %v493_v12 = vperm.slane %v1096_v8, 3  ;;  %v514_v13 = vsub.f32 %v510_v40, %v1244_v35 }
  0xfe   :  { %v875_v22 = vpop.eup %874  ;;  %v517_v60 = vmul.f32 1.442695, %v513_v7  ;;  %v549_v26 = vsub.f32 %v545_v20, %v1224_v62  ;;  %v550_v27 = vsub.f32 %v546_v11, %v1244_v35  ;;  %v577_v9 = vperm.slane %v1071_v37, 6 }
  0xff   :  { %v877_v16 = vpop.eup %876  ;;  %v390_v19 = vmul.f32 %v875_v22, %v386_v2  ;;  %v519_v10 = vmul.f32 1.442695, %v514_v13  ;;  %v458_v45 = vperm.slane %v1101_v15, 2  ;;  %v578_v24 = vperm.slane %v1075_v46, 6 }
 0x100   :  { %v879_v57 = vpop.eup %878  ;;  %v418_v28 = vadd.f32 %v877_v16, %v875_v22  ;;  %v426_v59 = vmul.f32 %v877_v16, %v422_v17  ;;  %886 = vpow2.f32 %v517_v60  ;;  %v553_v34 = vmul.f32 1.442695, %v549_v26 }
 0x101   :  { %v453_v29 = vadd.f32 %v879_v57, %v417_v5  ;;  %v461_v54 = vmul.f32 %v879_v57, %v457_v32  ;;  %v881_v36 = vpop.eup %880  ;;  %v555_v43 = vmul.f32 1.442695, %v550_v27  ;;  %v581_v47 = vmul.f32 %v577_v9, %v1083_v63 }
 0x102   :  { %v883_v38 = vpop.eup %882  ;;  %v497_v23 = vmul.f32 %v881_v36, %v493_v12  ;;  %888 = vpow2.f32 %v553_v34  ;;  %v430_v41 = vadd.f32 %v426_v59, %v390_v19  ;;  %v494_v30 = vperm.slane %v1101_v15, 3 }
 0x103   :  { %v465_v39 = vadd.f32 %v461_v54, %v429_v18  ;;  %v489_v42 = vadd.f32 %v881_v36, %v453_v29  ;;  %v885_v44 = vpop.eup %884  ;;  %v454_v1 = vadd.f32 %v883_v38, %v418_v28  ;;  %890 = vpow2.f32 %v519_v10 }
 0x104   :  { %v529_v33 = vperm.slane %v1096_v8, 4  ;;  %v565_v48 = vperm.slane %v1096_v8, 5  ;;  %v613_v25 = vperm.slane %v1071_v37, 7  ;;  %v462_v50 = vmul.f32 %v883_v38, %v458_v45 }
 0x105   :  { %v501_v4 = vadd.f32 %v497_v23, %v465_v39  ;;  %v582_v2 = vmul.f32 %v578_v24, %v1099_v14  ;;  %v585_v21 = vsub.f32 %v581_v47, %v1224_v62  ;;  %v614_v51 = vperm.slane %v1075_v46, 7 }
 0x106   :  { %v887_v49 = vpop.eup %886  ;;  %v490_v52 = vadd.f32 %v885_v44, %v454_v1  ;;  %v617_v53 = vmul.f32 %v613_v25, %v1083_v63  ;;  %v466_v56 = vadd.f32 %v462_v50, %v430_v41  ;;  %892 = vpow2.f32 %v555_v43  ;;  %v670_v25 = vpop.permute.xlu0 %669 }
 0x107   :  { %v525_v31 = vadd.f32 %v887_v49, %v489_v42  ;;  %v533_v61 = vmul.f32 %v887_v49, %v529_v33  ;;  %v586_v58 = vsub.f32 %v582_v2, %v1244_v35  ;;  %v589_v17 = vmul.f32 1.442695, %v585_v21  ;;  %v809_v33 = vld [vmem:[#allocation4] sm:$0xff] }
 0x108   :  { %v889_v55 = vpop.eup %888  ;;  %v618_v5 = vmul.f32 %v614_v51, %v1099_v14  ;;  %v621_v46 = vsub.f32 %v617_v53, %v1224_v62  ;;  %v498_v40 = vmul.f32 %v885_v44, %v494_v30  ;;  %v530_v18 = vperm.slane %v1101_v15, 4  ;;  %v680_v51 = vpop.permute.xlu2 %679 }
 0x109   :  { %v891_v37 = vpop.eup %890  ;;  %v537_v32 = vadd.f32 %v533_v61, %v501_v4  ;;  %v561_v0 = vadd.f32 %v889_v55, %v525_v31  ;;  %v569_v3 = vmul.f32 %v889_v55, %v565_v48  ;;  %894 = vpow2.f32 %v589_v17  ;;  %v810_v48 = vld [vmem:[#allocation4 + $0x8] sm:$0xff] }
 0x10a   :  { %v591_v6 = vmul.f32 1.442695, %v586_v58  ;;  %v526_v7 = vadd.f32 %v891_v37, %v490_v52  ;;  %v622_v63 = vsub.f32 %v618_v5, %v1244_v35  ;;  %v625_v11 = vmul.f32 1.442695, %v621_v46 }
 0x10b   :  { %v573_v20 = vadd.f32 %v569_v3, %v537_v32  ;;  %v502_v22 = vadd.f32 %v498_v40, %v466_v56  ;;  %v534_v16 = vmul.f32 %v891_v37, %v530_v18  ;;  %v601_v14 = vperm.slane %v1096_v8, 6 }
 0x10c   :  { %896 = vpow2.f32 %v591_v6  ;;  %v627_v12 = vmul.f32 1.442695, %v622_v63  ;;  %v893_v13 = vpop.eup %892  ;;  %v566_v26 = vperm.slane %v1101_v15, 5  ;;  %v637_v9 = vperm.slane %v1096_v8, 7 }
 0x10d   :  { %898 = vpow2.f32 %v625_v11  ;;  %v562_v19 = vadd.f32 %v893_v13, %v526_v7  ;;  %v538_v62 = vadd.f32 %v534_v16, %v502_v22  ;;  %v602_v36 = vperm.slane %v1101_v15, 6 }
 0x10e   :  { %900 = vpow2.f32 %v627_v12  ;;  %v570_v28 = vmul.f32 %v893_v13, %v566_v26  ;;  %v638_v1 = vperm.slane %v1101_v15, 7  ;;  %v675_v15 = vpop.permute.xlu1 %674  ;;  %v685_v61 = vpop.permute.xlu0 %684 }
 0x10f   :  { %v895_v60 = vpop.eup %894 }
 0x110   :  { %v597_v27 = vadd.f32 %v895_v60, %v561_v0  ;;  %v605_v57 = vmul.f32 %v895_v60, %v601_v14  ;;  %v574_v34 = vadd.f32 %v570_v28, %v538_v62 }
 0x112   :  { %v897_v35 = vpop.eup %896  ;;  %v609_v10 = vadd.f32 %v605_v57, %v573_v20 }
 0x113   :  { %v598_v59 = vadd.f32 %v897_v35, %v562_v19  ;;  %v899_v29 = vpop.eup %898  ;;  %v606_v23 = vmul.f32 %v897_v35, %v602_v36 }
 0x114   :  { %v901_v54 = vpop.eup %900  ;;  %v633_v38 = vadd.f32 %v899_v29, %v597_v27  ;;  %v641_v39 = vmul.f32 %v899_v29, %v637_v9 }
 0x115   :  { %v634_v42 = vadd.f32 %v901_v54, %v598_v59  ;;  %v610_v41 = vadd.f32 %v606_v23, %v574_v34  ;;  %v642_v45 = vmul.f32 %v901_v54, %v638_v1 }
 0x116   :  { %v645_v44 = vadd.f32 %v641_v39, %v609_v10  ;;  %902 = vrcp.f32 %v633_v38 }
 0x117   :  { %904 = vrcp.f32 %v634_v42  ;;  %v646_v43 = vadd.f32 %v642_v45, %v610_v41 }
 0x11c   :  { %v903_v4 = vpop.eup %902 }
 0x11d   :  { %v905_v24 = vpop.eup %904  ;;  %v653_v8 = vmul.f32 %v903_v4, %v645_v44 }
 0x11e   :  { %v654_v47 = vmul.f32 %v905_v24, %v646_v43 }
 0x120   :  { %v657_v30 = vpack.c.bf16 %v654_v47, %v653_v8 }
 0x122   :  { %711 = vmatpush.bf16.msra.mxu1 %v657_v30 }
 0x125   :  { %795 = vmatmul.msk.bf16.vlgmr.msra.gmra.mxu1 %vm697_vm6, %v809_v33 }
 0x135   :  { %796 = vmatmul.msk.bf16.gmra.mxu1 %vm697_vm6, %v810_v48 }
 0x1a2   :  { %v713_v49 = vpop.f32.mrf.mxu1 }
 0x1a3   :  { %v714_v50 = vadd.f32 %v713_v49, %v670_v25 }
 0x1a5   :  { %723 = vst.msk [vmem:[%s1317_s5] sm:$0xff] %vm288_vm1, %v714_v50 }
 0x1aa   :  { %v715_v2 = vpop.f32.mrf.mxu1 }
 0x1ab   :  { %v716_v21 = vadd.f32 %v715_v2, %v675_v15 }
 0x1ad   :  { %724 = vst.msk [vmem:[%s1317_s5 + $0x8] sm:$0xff] %vm288_vm1, %v716_v21 }
 0x1b2   :  { %v718_v52 = vpop.f32.mrf.mxu1 }
 0x1b3   :  { %v719_v31 = vadd.f32 %v718_v52, %v680_v51 }
 0x1b5   :  { %725 = vst.msk [vmem:[%s1317_s5 + $0x10] sm:$0xff] %vm288_vm1, %v719_v31 }
 0x1ba   :  { %v720_v53 = vpop.f32.mrf.mxu1 }
 0x1bb   :  { %v721_v55 = vadd.f32 %v720_v53, %v685_v61 }
 0x1bd   :  { %726 = vst.msk [vmem:[%s1317_s5 + $0x18] sm:$0xff] %vm288_vm1, %v721_v55 }
 0x1be   :  { %731 = vsyncpa [#allocation3], 1 }
 0x1bf   :  { %732 = vsyncpa [#allocation5], 1 }

</bundles_post_ra>
